<compile_context>
chip_gen: v7x
topology: tpu7x:2x2x1
jax: 0.10.0
libtpu: 0.0.40
codegen_flags: <defaults>
</compile_context>

<pallas_src>
import functools
import math

import jax
import jax.numpy as jnp
from jax import lax
from jax.experimental import pallas as pl
from jax.experimental.pallas import tpu as pltpu


LANE = 128          # TPU lane width; every feature dim is zero-padded to this
NEG_BIG = 1e30      # additive-mask sentinel (finite; avoids inf-inf NaNs)
F32 = jnp.float32
BF16 = jnp.bfloat16


def _round_up(x, m):
    return ((x + m - 1) // m) * m


def _vmem_limit(working_set_bytes):
    # generous headroom above the estimated working set, floor at 32 MiB
    # (above v5e's 16 MiB default scoped), ceiling below v7x's 64 MiB physical.
    return int(min(max(2 * working_set_bytes, 32 << 20), 48 << 20))


# ----------------------------------------------------------------------------
# Path 1: fused single-call forward (small graphs; everything VMEM resident)
# ----------------------------------------------------------------------------
def _make_fused_forward_kernel(negative_slope: float):
    def kernel(x_ref, adj_ref,
               pw_ref, pb_ref,
               w1_ref, b1_ref, w2_ref, b2_ref, w3_ref, b3_ref,
               ow_ref, ob_ref,
               emb_ref, logit_ref):

        def linear(h, w_ref, b_ref):
            # bf16 operands on the MXU, f32 accumulation, f32 bias add
            return (jnp.dot(h.astype(BF16), w_ref[...],
                            preferred_element_type=F32) + b_ref[...])

        def conv(h, w_ref, b_ref):
            # one fused Q|skip|K|V projection; each slab 128-lane aligned
            proj = linear(h, w_ref, b_ref)            # (N, 4*LANE)
            q = proj[:, 0 * LANE:1 * LANE]
            skip = proj[:, 1 * LANE:2 * LANE]
            k = proj[:, 2 * LANE:3 * LANE]
            v = proj[:, 3 * LANE:4 * LANE]
            # rebuild the edge mask from the resident int8 adjacency each
            # layer (no full-lifetime f32 adj / additive-mask copies)
            mask = adj_ref[...].astype(F32) > 0.0
            # scores[i, j] = <q_i, k_j> for edge j -> i
            # (1/sqrt(C) already folded into the packed Q weight/bias)
            s = lax.dot_general(q.astype(BF16), k.astype(BF16),
                                (((1,), (1,)), ((), ())),
                                preferred_element_type=F32)
            s = jnp.where(mask, s, -NEG_BIG)
            m = jnp.max(s, axis=-1, keepdims=True)
            e = jnp.where(mask, jnp.exp(s - m), 0.0)   # no-neighbor rows -> 0
            denom = jnp.sum(e, axis=-1, keepdims=True)
            inv = pl.reciprocal(jnp.where(denom > 0.0, denom, 1.0), approx=True)
            alpha = (e * inv).astype(BF16)
            attn = jnp.dot(alpha, v.astype(BF16), preferred_element_type=F32)
            y = attn + skip                            # root_weight, concat=True
            # fused LeakyReLU(negative_slope) that follows every conv
            return jnp.where(y > 0.0, y, negative_slope * y)

        h = linear(x_ref[...], pw_ref, pb_ref)         # pheno_transform
        h = conv(h, w1_ref, b1_ref)                    # conv_first  + act
        h = conv(h, w2_ref, b2_ref)                    # conv_block  + act
        h = conv(h, w3_ref, b3_ref)                    # conv_last   + act
        emb_ref[...] = h.astype(emb_ref.dtype)         # x_embed (bf16 store)
        logit_ref[...] = linear(h, ow_ref, ob_ref).astype(logit_ref.dtype)

    return kernel


def fused_gig_forward(x_pad, adj_pad, packed, negative_slope=0.5):
    n = x_pad.shape[0]
    vmem = pl.BlockSpec(memory_space=pltpu.MemorySpace.VMEM)
    # int8 adj + ~6 f32 N^2 temporaries + small activations
    working = n * n * (1 + 6 * 4) + (2 << 20)
    return pl.pallas_call(
        _make_fused_forward_kernel(negative_slope),
        out_shape=(jax.ShapeDtypeStruct((n, LANE), BF16),
                   jax.ShapeDtypeStruct((n, LANE), F32)),
        in_specs=[vmem] * 12,
        out_specs=[vmem, vmem],
        compiler_params=pltpu.CompilerParams(
            vmem_limit_bytes=_vmem_limit(working)),
    )(x_pad, adj_pad,
      packed["pheno_w"], packed["pheno_b"],
      packed["conv_first_w"], packed["conv_first_b"],
      packed["conv_block_w"], packed["conv_block_b"],
      packed["conv_last_w"], packed["conv_last_b"],
      packed["out_w"], packed["out_b"])


# ----------------------------------------------------------------------------
# Path 2: dst-row-tiled forward (large graphs; N^2 never fully VMEM resident)
# ----------------------------------------------------------------------------
def _linear_kernel(h_ref, w_ref, b_ref, o_ref):
    o_ref[...] = (jnp.dot(h_ref[...].astype(BF16), w_ref[...],
                          preferred_element_type=F32)
                  + b_ref[...]).astype(o_ref.dtype)


def _project_kernel(h_ref, w_ref, b_ref, qs_ref, kv_ref):
    proj = (jnp.dot(h_ref[...].astype(BF16), w_ref[...],
                    preferred_element_type=F32) + b_ref[...])
    qs_ref[...] = proj[:, : 2 * LANE]                  # q | skip  (f32, tiled)
    kv_ref[...] = proj[:, 2 * LANE:].astype(BF16)      # k | v     (bf16, full-N resident)


def _make_attend_kernel(negative_slope: float):
    def kernel(qs_ref, kv_ref, adj_ref, o_ref):
        mask = adj_ref[...].astype(F32) > 0.0          # (TQ, N) from int8 tile
        q = qs_ref[:, :LANE].astype(BF16)
        skip = qs_ref[:, LANE:]
        k = kv_ref[:, :LANE]
        v = kv_ref[:, LANE:]
        s = lax.dot_general(q, k, (((1,), (1,)), ((), ())),
                            preferred_element_type=F32)    # (TQ, N)
        s = jnp.where(mask, s, -NEG_BIG)
        m = jnp.max(s, axis=-1, keepdims=True)
        e = jnp.where(mask, jnp.exp(s - m), 0.0)
        denom = jnp.sum(e, axis=-1, keepdims=True)
        inv = pl.reciprocal(jnp.where(denom > 0.0, denom, 1.0), approx=True)
        alpha = (e * inv).astype(BF16)
        attn = jnp.dot(alpha, v, preferred_element_type=F32)
        y = attn + skip
        o_ref[...] = jnp.where(y > 0.0, y, negative_slope * y).astype(o_ref.dtype)
    return kernel


def _row_parallel_params(est_bytes):
    return pltpu.CompilerParams(dimension_semantics=("parallel",),
                                vmem_limit_bytes=_vmem_limit(est_bytes))


def tiled_linear(h, w, b, tq, out_dtype=F32):
    n, cols = h.shape[0], w.shape[1]
    est = 2 * tq * (h.shape[1] + cols) * 4 + w.size * 2 + (1 << 20)
    return pl.pallas_call(
        _linear_kernel,
        out_shape=jax.ShapeDtypeStruct((n, cols), out_dtype),
        grid=(n // tq,),
        in_specs=[pl.BlockSpec((tq, h.shape[1]), lambda i: (i, 0)),
                  pl.BlockSpec(w.shape, lambda i: (0, 0)),
                  pl.BlockSpec(b.shape, lambda i: (0, 0))],
        out_specs=pl.BlockSpec((tq, cols), lambda i: (i, 0)),
        compiler_params=_row_parallel_params(est),
    )(h, w, b)


def tiled_project(h, w, b, tq):
    n = h.shape[0]
    est = 2 * tq * (LANE + 4 * LANE + 4 * LANE) * 4 + w.size * 2 + (1 << 20)
    return pl.pallas_call(
        _project_kernel,
        out_shape=(jax.ShapeDtypeStruct((n, 2 * LANE), F32),
                   jax.ShapeDtypeStruct((n, 2 * LANE), BF16)),
        grid=(n // tq,),
        in_specs=[pl.BlockSpec((tq, h.shape[1]), lambda i: (i, 0)),
                  pl.BlockSpec(w.shape, lambda i: (0, 0)),
                  pl.BlockSpec(b.shape, lambda i: (0, 0))],
        out_specs=[pl.BlockSpec((tq, 2 * LANE), lambda i: (i, 0)),
                   pl.BlockSpec((tq, 2 * LANE), lambda i: (i, 0))],
        compiler_params=_row_parallel_params(est),
    )(h, w, b)


def tiled_attend(qs, kv, adj, tq, negative_slope, out_dtype):
    n = qs.shape[0]
    est = (2 * n * 2 * LANE * 2          # full-N K|V slab (bf16, double-buffered)
           + 2 * tq * 2 * LANE * 4       # q|skip tile
           + 2 * tq * n                  # int8 adjacency row slab
           + 2 * tq * LANE * 4           # output tile
           + 4 * tq * n * 4)             # score / exp / alpha temporaries
    return pl.pallas_call(
        _make_attend_kernel(negative_slope),
        out_shape=jax.ShapeDtypeStruct((n, LANE), out_dtype),
        grid=(n // tq,),
        in_specs=[pl.BlockSpec((tq, 2 * LANE), lambda i: (i, 0)),    # q|skip tile
                  pl.BlockSpec((n, 2 * LANE), lambda i: (0, 0)),     # resident K|V
                  pl.BlockSpec((tq, n), lambda i: (i, 0))],          # adj row slab
        out_specs=pl.BlockSpec((tq, LANE), lambda i: (i, 0)),
        compiler_params=_row_parallel_params(est),
    )(qs, kv, adj)


def tiled_gig_forward(x_pad, adj_pad, packed, tq, negative_slope=0.5):
    h = tiled_linear(x_pad, packed["pheno_w"], packed["pheno_b"], tq)   # pheno
    for name in ("conv_first", "conv_block", "conv_last"):
        qs, kv = tiled_project(h, packed[name + "_w"], packed[name + "_b"], tq)
        out_dtype = BF16 if name == "conv_last" else F32
        h = tiled_attend(qs, kv, adj_pad, tq, negative_slope, out_dtype)
    logit = tiled_linear(h, packed["out_w"], packed["out_b"], tq)       # out
    return h, logit


# ----------------------------------------------------------------------------
# Parameter construction (deterministic glorot-uniform init, actual dims)
# ----------------------------------------------------------------------------
def glorot(key, fan_in, fan_out, shape=None):
    if shape is None:
        shape = (fan_in, fan_out)
    limit = math.sqrt(6.0 / (fan_in + fan_out))
    return jax.random.uniform(key, shape, F32, -limit, limit)


def init_conv_params(key, in_dim, out_channels, heads):
    hc = heads * out_channels
    ks = jax.random.split(key, 4)
    return {
        "wq": glorot(ks[0], in_dim, hc), "bq": jnp.zeros((1, hc), F32),
        "wk": glorot(ks[1], in_dim, hc), "bk": jnp.zeros((1, hc), F32),
        "wv": glorot(ks[2], in_dim, hc), "bv": jnp.zeros((1, hc), F32),
        "wskip": glorot(ks[3], in_dim, hc), "bskip": jnp.zeros((1, hc), F32),
    }


def init_gig_transformer_params(key, cfg):
    ks = jax.random.split(key, 10)
    p = {}
    # parameters from __init__ (unused under graph_opt='subject', kept for fidelity)
    p["node_weight_assign"] = glorot(
        ks[0], cfg["gene_num_top_feature"], cfg["num_gene_node"])
    p["key_node_weight_assign"] = glorot(
        ks[1], cfg["gene_num_top_feature"], cfg["num_key_gene_node"])
    p["gene_transform_w"] = glorot(
        ks[2], cfg["gene_num_top_feature"] * cfg["gene_embedding_dim"],
        cfg["gig_embedding_dim"])
    # subject-path parameters
    p["pheno_w"] = glorot(ks[3], cfg["gig_input_dim"], cfg["gig_input_transform_dim"])
    p["pheno_b"] = jnp.zeros((1, cfg["gig_input_transform_dim"]), F32)
    h = cfg["gig_num_head"]
    p["conv_first"] = init_conv_params(
        ks[4], cfg["gig_input_transform_dim"], cfg["gig_hidden_dim"], h)
    p["conv_block"] = init_conv_params(
        ks[5], h * cfg["gig_hidden_dim"], cfg["gig_hidden_dim"], h)
    p["conv_last"] = init_conv_params(
        ks[6], h * cfg["gig_hidden_dim"], cfg["gig_embedding_dim"], h)
    p["out_w"] = glorot(ks[7], cfg["gig_embedding_dim"], cfg["num_classes"])
    p["out_b"] = jnp.zeros((1, cfg["num_classes"]), F32)   # bias=False
    return p


# ----------------------------------------------------------------------------
# Pack parameters into the lane-padded, fused Q|skip|K|V, bf16 kernel layout
# ----------------------------------------------------------------------------
_SLAB_ORDER = ("q", "skip", "k", "v")


def _pad_weight(w):
    out = jnp.zeros((LANE, LANE), F32)
    out = out.at[: w.shape[0], : w.shape[1]].set(w)
    return out.astype(BF16)


def _pad_bias(b, cols=LANE):
    out = jnp.zeros((1, cols), F32)
    return out.at[:, : b.shape[-1]].set(b.reshape(1, -1))


def _pack_conv(p, q_scale):
    # fused Q|skip|K|V weight: (128, 4*128); each projection in its own
    # 128-lane-aligned slab. The 1/sqrt(C) attention scale is folded into the
    # Q slab (weight AND bias) so the kernel never multiplies the N^2 scores.
    w = jnp.zeros((LANE, 4 * LANE), F32)
    b = jnp.zeros((1, 4 * LANE), F32)
    for i, name in enumerate(_SLAB_ORDER):
        sc = q_scale if name == "q" else 1.0
        ww = p["w" + name] * sc
        bb = p["b" + name] * sc
        w = w.at[: ww.shape[0], i * LANE: i * LANE + ww.shape[1]].set(ww)
        b = b.at[:, i * LANE: i * LANE + bb.shape[-1]].set(bb.reshape(1, -1))
    return w.astype(BF16), b


def pack_params(params, cfg):
    assert cfg["gig_num_head"] == 1, "gig conv stack only type-checks with 1 head"
    for d in (cfg["gig_input_dim"], cfg["gig_input_transform_dim"],
              cfg["gig_hidden_dim"], cfg["gig_embedding_dim"], cfg["num_classes"]):
        assert d <= LANE
    packed = {
        "pheno_w": _pad_weight(params["pheno_w"]),
        "pheno_b": _pad_bias(params["pheno_b"]),
        "out_w": _pad_weight(params["out_w"]),
        "out_b": _pad_bias(params["out_b"]),
    }
    q_scales = {
        "conv_first": 1.0 / math.sqrt(cfg["gig_hidden_dim"]),
        "conv_block": 1.0 / math.sqrt(cfg["gig_hidden_dim"]),
        "conv_last": 1.0 / math.sqrt(cfg["gig_embedding_dim"]),
    }
    for name in ("conv_first", "conv_block", "conv_last"):
        w, b = _pack_conv(params[name], q_scales[name])
        packed[name + "_w"] = w
        packed[name + "_b"] = b
    return packed


# ----------------------------------------------------------------------------
# Graph preparation (adjacency built ONCE per graph, not per forward call)
# ----------------------------------------------------------------------------
def edge_index_to_dense_adj(edge_index, num_nodes):
    # adj[dst, src] = 1  (PyG flow source_to_target)
    src, dst = edge_index[0], edge_index[1]
    adj = jnp.zeros((num_nodes, num_nodes), jnp.int8)
    return adj.at[dst, src].set(1)


def fused_path_fits(num_nodes, budget_bytes=24 << 20):
    n = _round_up(num_nodes, 8)
    return n * n * (1 + 5 * 4) <= budget_bytes   # int8 adj + ~5 f32 N^2 temps


def prepare_graph(edge_index, num_nodes, *, tile_rows=256, use_tiled=None):
    """Builds the padded dense int8 adjacency and picks the execution path."""
    if use_tiled is None:
        use_tiled = not fused_path_fits(num_nodes)
    n_pad = _round_up(num_nodes, tile_rows if use_tiled else 8)
    adj = edge_index_to_dense_adj(edge_index, num_nodes)
    adj_pad = jnp.zeros((n_pad, n_pad), jnp.int8).at[:num_nodes, :num_nodes].set(adj)
    return adj_pad, use_tiled


# ----------------------------------------------------------------------------
# Forward pass (graph_opt = 'subject')
# ----------------------------------------------------------------------------
def gig_transformer_forward(packed, cfg, x, adj_pad, node_index,
                            *, use_tiled, tile_rows=256):
    n = x.shape[0]
    n_pad = adj_pad.shape[0]
    x_pad = jnp.pad(x.astype(F32), ((0, n_pad - n), (0, LANE - x.shape[1])))

    if use_tiled:
        emb_pad, logit_pad = tiled_gig_forward(x_pad, adj_pad, packed, tile_rows)
    else:
        emb_pad, logit_pad = fused_gig_forward(x_pad, adj_pad, packed)

    emb_dim = cfg["gig_num_head"] * cfg["gig_embedding_dim"]
    x_embed = emb_pad[:n, :emb_dim].astype(F32)
    output = logit_pad[:n, :cfg["num_classes"]]
    node_output = output[node_index]
    ypred = jnp.argmax(output, axis=1)
    y_nodepred = ypred[node_index]
    return x_embed, node_output, ypred, y_nodepred


# ----------------------------------------------------------------------------
# Demo
# ----------------------------------------------------------------------------
if __name__ == "__main__":
    cfg = dict(
        gene_input_dim=4,
        gene_hidden_dim=8,
        gene_embedding_dim=8,
        gene_num_top_feature=4,
        num_gene_node=16,
        num_key_gene_node=8,
        gig_input_dim=12,
        gig_input_transform_dim=16,
        gig_hidden_dim=8,
        gig_embedding_dim=8,
        num_classes=3,
        gene_num_head=1,
        gig_num_head=1,   # module only type-checks with 1 head
    )

    root = jax.random.PRNGKey(0)
    k_param, k_x1, k_e1, k_x2, k_e2 = jax.random.split(root, 5)

    params = init_gig_transformer_params(k_param, cfg)
    packed = pack_params(params, cfg)

    def make_edges(key, n, e):
        # duplicate-free edge set so dense-adj softmax == PyG edge-wise softmax
        pair_ids = jax.random.permutation(key, n * n)[:e]
        src = (pair_ids // n).astype(jnp.int32)
        dst = (pair_ids % n).astype(jnp.int32)
        return jnp.stack([src, dst], axis=0)           # (2, E)

    # --- small subject graph (N=16): fused single-call path -----------------
    num_subfeature, num_subject = 4, 12
    n1 = num_subfeature + num_subject
    x1 = jax.random.normal(k_x1, (n1, cfg["gig_input_dim"]), F32)
    edge_index1 = make_edges(k_e1, n1, 48)
    node_index1 = jnp.arange(num_subfeature, n1)       # subject nodes
    adj1, tiled1 = prepare_graph(edge_index1, n1)
    assert not tiled1                                   # small graph -> fused

    fwd_fused = jax.jit(functools.partial(
        gig_transformer_forward, packed, cfg, use_tiled=False))
    x_embed, node_output, ypred, y_nodepred = fwd_fused(x1, adj1, node_index1)
    jax.block_until_ready((x_embed, node_output, ypred, y_nodepred))

    assert x_embed.shape == (n1, cfg["gig_num_head"] * cfg["gig_embedding_dim"])
    assert node_output.shape == (num_subject, cfg["num_classes"])
    assert ypred.shape == (n1,)
    assert y_nodepred.shape == (num_subject,)
    assert bool(jnp.all(jnp.isfinite(x_embed)))
    assert bool(jnp.all(jnp.isfinite(node_output)))

    # --- larger graph (N=300): dst-row-tiled path, cross-checked vs fused ---
    TQ = 256
    n2, e2 = 300, 4000
    x2 = jax.random.normal(k_x2, (n2, cfg["gig_input_dim"]), F32)
    edge_index2 = make_edges(k_e2, n2, e2)
    node_index2 = jnp.arange(n2)
    adj2_t, _ = prepare_graph(edge_index2, n2, tile_rows=TQ, use_tiled=True)
    adj2_f, _ = prepare_graph(edge_index2, n2, use_tiled=False)

    fwd_tiled = jax.jit(functools.partial(
        gig_transformer_forward, packed, cfg, use_tiled=True, tile_rows=TQ))
    emb_t, out_t, yp_t, _ = fwd_tiled(x2, adj2_t, node_index2)
    emb_f, out_f, yp_f, _ = fwd_fused(x2, adj2_f, node_index2)
    jax.block_until_ready((emb_t, out_t, emb_f, out_f))

    assert bool(jnp.all(jnp.isfinite(emb_t)))
    assert bool(jnp.all(jnp.isfinite(out_t)))
    assert bool(jnp.allclose(emb_t, emb_f, rtol=2e-2, atol=2e-2))
    assert bool(jnp.allclose(out_t, out_f, rtol=2e-2, atol=2e-2))

    print("KERNEL_OK")
</pallas_src>

<mosaic_0001>
module attributes {stable_mosaic.version = 11 : i64} {
  func.func @kernel(%arg0: memref<16x128xf32, #tpu.memory_space<vmem>>, %arg1: memref<16x16xi8, #tpu.memory_space<vmem>>, %arg2: memref<128x128xbf16, #tpu.memory_space<vmem>>, %arg3: memref<1x128xf32, #tpu.memory_space<vmem>>, %arg4: memref<128x512xbf16, #tpu.memory_space<vmem>>, %arg5: memref<1x512xf32, #tpu.memory_space<vmem>>, %arg6: memref<128x512xbf16, #tpu.memory_space<vmem>>, %arg7: memref<1x512xf32, #tpu.memory_space<vmem>>, %arg8: memref<128x512xbf16, #tpu.memory_space<vmem>>, %arg9: memref<1x512xf32, #tpu.memory_space<vmem>>, %arg10: memref<128x128xbf16, #tpu.memory_space<vmem>>, %arg11: memref<1x128xf32, #tpu.memory_space<vmem>>, %arg12: memref<16x128xbf16, #tpu.memory_space<vmem>>, %arg13: memref<16x128xf32, #tpu.memory_space<vmem>>) attributes {dimension_semantics = [], scalar_prefetch = 0 : i64, scratch_operands = 0 : i64, tpu.core_type = #tpu.core_type<tc>} {
    %c0 = arith.constant 0 : index
    %c0_0 = arith.constant 0 : index
    %0 = vector.load %arg0[%c0, %c0_0] : memref<16x128xf32, #tpu.memory_space<vmem>>, vector<16x128xf32>
    %1 = arith.truncf %0 : vector<16x128xf32> to vector<16x128xbf16>
    %c0_1 = arith.constant 0 : index
    %c0_2 = arith.constant 0 : index
    %2 = vector.load %arg2[%c0_1, %c0_2] : memref<128x128xbf16, #tpu.memory_space<vmem>>, vector<128x128xbf16>
    %cst = arith.constant dense<0.000000e+00> : vector<16x128xf32>
    %3 = tpu.matmul %1, %2, %cst {dimension_numbers = #tpu.dot_dimension_numbers<[1], [0], [0], [1], [0, 0, 1, 1], [], []>} : vector<16x128xbf16>, vector<128x128xbf16>, vector<16x128xf32> -> vector<16x128xf32>
    %c0_3 = arith.constant 0 : index
    %c0_4 = arith.constant 0 : index
    %4 = vector.load %arg3[%c0_3, %c0_4] : memref<1x128xf32, #tpu.memory_space<vmem>>, vector<1x128xf32>
    %5 = vector.broadcast %4 : vector<1x128xf32> to vector<16x128xf32>
    %6 = arith.addf %3, %5 : vector<16x128xf32>
    %7 = arith.truncf %6 : vector<16x128xf32> to vector<16x128xbf16>
    %c0_5 = arith.constant 0 : index
    %c0_6 = arith.constant 0 : index
    %8 = vector.load %arg4[%c0_5, %c0_6] : memref<128x512xbf16, #tpu.memory_space<vmem>>, vector<128x512xbf16>
    %cst_7 = arith.constant dense<0.000000e+00> : vector<16x512xf32>
    %9 = tpu.matmul %7, %8, %cst_7 {dimension_numbers = #tpu.dot_dimension_numbers<[1], [0], [0], [1], [0, 0, 1, 1], [], []>} : vector<16x128xbf16>, vector<128x512xbf16>, vector<16x512xf32> -> vector<16x512xf32>
    %c0_8 = arith.constant 0 : index
    %c0_9 = arith.constant 0 : index
    %10 = vector.load %arg5[%c0_8, %c0_9] : memref<1x512xf32, #tpu.memory_space<vmem>>, vector<1x512xf32>
    %11 = vector.broadcast %10 : vector<1x512xf32> to vector<16x512xf32>
    %12 = arith.addf %9, %11 : vector<16x512xf32>
    %13 = vector.extract_strided_slice %12 {offsets = [0, 0], sizes = [16, 128], strides = [1, 1]} : vector<16x512xf32> to vector<16x128xf32>
    %14 = vector.extract_strided_slice %12 {offsets = [0, 128], sizes = [16, 128], strides = [1, 1]} : vector<16x512xf32> to vector<16x128xf32>
    %15 = vector.extract_strided_slice %12 {offsets = [0, 256], sizes = [16, 128], strides = [1, 1]} : vector<16x512xf32> to vector<16x128xf32>
    %16 = vector.extract_strided_slice %12 {offsets = [0, 384], sizes = [16, 128], strides = [1, 1]} : vector<16x512xf32> to vector<16x128xf32>
    %c0_10 = arith.constant 0 : index
    %c0_11 = arith.constant 0 : index
    %17 = vector.load %arg1[%c0_10, %c0_11] : memref<16x16xi8, #tpu.memory_space<vmem>>, vector<16x16xi8>
    %18 = arith.sitofp %17 : vector<16x16xi8> to vector<16x16xf32>
    %cst_12 = arith.constant 0.000000e+00 : f32
    %19 = vector.broadcast %cst_12 : f32 to vector<16x16xf32>
    %20 = arith.cmpf ogt, %18, %19 : vector<16x16xf32>
    %21 = arith.truncf %13 : vector<16x128xf32> to vector<16x128xbf16>
    %22 = arith.truncf %15 : vector<16x128xf32> to vector<16x128xbf16>
    %cst_13 = arith.constant dense<0.000000e+00> : vector<16x16xf32>
    %23 = tpu.matmul %21, %22, %cst_13 {dimension_numbers = #tpu.dot_dimension_numbers<[1], [1], [0], [0], [0, 0, 1, 0], [], []>} : vector<16x128xbf16>, vector<16x128xbf16>, vector<16x16xf32> -> vector<16x16xf32>
    %cst_14 = arith.constant -1.000000e+30 : f32
    %24 = vector.broadcast %cst_14 : f32 to vector<16x16xf32>
    %25 = arith.select %20, %23, %24 : vector<16x16xi1>, vector<16x16xf32>
    %cst_15 = arith.constant dense<0xFF800000> : vector<16xf32>
    %26 = vector.multi_reduction <maximumf>, %25, %cst_15 [1] : vector<16x16xf32> to vector<16xf32>
    %27 = vector.shape_cast %26 : vector<16xf32> to vector<16x1xf32>
    %28 = vector.broadcast %27 : vector<16x1xf32> to vector<16x16xf32>
    %29 = arith.subf %25, %28 : vector<16x16xf32>
    %30 = math.exp %29 : vector<16x16xf32>
    %cst_16 = arith.constant 0.000000e+00 : f32
    %31 = vector.broadcast %cst_16 : f32 to vector<16x16xf32>
    %32 = arith.select %20, %30, %31 : vector<16x16xi1>, vector<16x16xf32>
    %cst_17 = arith.constant dense<0.000000e+00> : vector<16xf32>
    %33 = vector.multi_reduction <add>, %32, %cst_17 [1] : vector<16x16xf32> to vector<16xf32>
    %34 = vector.shape_cast %33 : vector<16xf32> to vector<16x1xf32>
    %cst_18 = arith.constant 0.000000e+00 : f32
    %35 = vector.broadcast %cst_18 : f32 to vector<16x1xf32>
    %36 = arith.cmpf ogt, %34, %35 : vector<16x1xf32>
    %cst_19 = arith.constant 1.000000e+00 : f32
    %37 = vector.broadcast %cst_19 : f32 to vector<16x1xf32>
    %38 = arith.select %36, %34, %37 : vector<16x1xi1>, vector<16x1xf32>
    %39 = tpu.reciprocal %38 {approx = true} : vector<16x1xf32> -> vector<16x1xf32>
    %40 = vector.broadcast %39 : vector<16x1xf32> to vector<16x16xf32>
    %41 = arith.mulf %32, %40 : vector<16x16xf32>
    %42 = arith.truncf %41 : vector<16x16xf32> to vector<16x16xbf16>
    %43 = arith.truncf %16 : vector<16x128xf32> to vector<16x128xbf16>
    %cst_20 = arith.constant dense<0.000000e+00> : vector<16x128xf32>
    %44 = tpu.matmul %42, %43, %cst_20 {dimension_numbers = #tpu.dot_dimension_numbers<[1], [0], [0], [1], [0, 0, 1, 1], [], []>} : vector<16x16xbf16>, vector<16x128xbf16>, vector<16x128xf32> -> vector<16x128xf32>
    %45 = arith.addf %44, %14 : vector<16x128xf32>
    %cst_21 = arith.constant 0.000000e+00 : f32
    %46 = vector.broadcast %cst_21 : f32 to vector<16x128xf32>
    %47 = arith.cmpf ogt, %45, %46 : vector<16x128xf32>
    %cst_22 = arith.constant 5.000000e-01 : f32
    %48 = vector.broadcast %cst_22 : f32 to vector<16x128xf32>
    %49 = arith.mulf %48, %45 : vector<16x128xf32>
    %50 = arith.select %47, %45, %49 : vector<16x128xi1>, vector<16x128xf32>
    %51 = arith.truncf %50 : vector<16x128xf32> to vector<16x128xbf16>
    %c0_23 = arith.constant 0 : index
    %c0_24 = arith.constant 0 : index
    %52 = vector.load %arg6[%c0_23, %c0_24] : memref<128x512xbf16, #tpu.memory_space<vmem>>, vector<128x512xbf16>
    %cst_25 = arith.constant dense<0.000000e+00> : vector<16x512xf32>
    %53 = tpu.matmul %51, %52, %cst_25 {dimension_numbers = #tpu.dot_dimension_numbers<[1], [0], [0], [1], [0, 0, 1, 1], [], []>} : vector<16x128xbf16>, vector<128x512xbf16>, vector<16x512xf32> -> vector<16x512xf32>
    %c0_26 = arith.constant 0 : index
    %c0_27 = arith.constant 0 : index
    %54 = vector.load %arg7[%c0_26, %c0_27] : memref<1x512xf32, #tpu.memory_space<vmem>>, vector<1x512xf32>
    %55 = vector.broadcast %54 : vector<1x512xf32> to vector<16x512xf32>
    %56 = arith.addf %53, %55 : vector<16x512xf32>
    %57 = vector.extract_strided_slice %56 {offsets = [0, 0], sizes = [16, 128], strides = [1, 1]} : vector<16x512xf32> to vector<16x128xf32>
    %58 = vector.extract_strided_slice %56 {offsets = [0, 128], sizes = [16, 128], strides = [1, 1]} : vector<16x512xf32> to vector<16x128xf32>
    %59 = vector.extract_strided_slice %56 {offsets = [0, 256], sizes = [16, 128], strides = [1, 1]} : vector<16x512xf32> to vector<16x128xf32>
    %60 = vector.extract_strided_slice %56 {offsets = [0, 384], sizes = [16, 128], strides = [1, 1]} : vector<16x512xf32> to vector<16x128xf32>
    %c0_28 = arith.constant 0 : index
    %c0_29 = arith.constant 0 : index
    %61 = vector.load %arg1[%c0_28, %c0_29] : memref<16x16xi8, #tpu.memory_space<vmem>>, vector<16x16xi8>
    %62 = arith.sitofp %61 : vector<16x16xi8> to vector<16x16xf32>
    %cst_30 = arith.constant 0.000000e+00 : f32
    %63 = vector.broadcast %cst_30 : f32 to vector<16x16xf32>
    %64 = arith.cmpf ogt, %62, %63 : vector<16x16xf32>
    %65 = arith.truncf %57 : vector<16x128xf32> to vector<16x128xbf16>
    %66 = arith.truncf %59 : vector<16x128xf32> to vector<16x128xbf16>
    %cst_31 = arith.constant dense<0.000000e+00> : vector<16x16xf32>
    %67 = tpu.matmul %65, %66, %cst_31 {dimension_numbers = #tpu.dot_dimension_numbers<[1], [1], [0], [0], [0, 0, 1, 0], [], []>} : vector<16x128xbf16>, vector<16x128xbf16>, vector<16x16xf32> -> vector<16x16xf32>
    %cst_32 = arith.constant -1.000000e+30 : f32
    %68 = vector.broadcast %cst_32 : f32 to vector<16x16xf32>
    %69 = arith.select %64, %67, %68 : vector<16x16xi1>, vector<16x16xf32>
    %cst_33 = arith.constant dense<0xFF800000> : vector<16xf32>
    %70 = vector.multi_reduction <maximumf>, %69, %cst_33 [1] : vector<16x16xf32> to vector<16xf32>
    %71 = vector.shape_cast %70 : vector<16xf32> to vector<16x1xf32>
    %72 = vector.broadcast %71 : vector<16x1xf32> to vector<16x16xf32>
    %73 = arith.subf %69, %72 : vector<16x16xf32>
    %74 = math.exp %73 : vector<16x16xf32>
    %cst_34 = arith.constant 0.000000e+00 : f32
    %75 = vector.broadcast %cst_34 : f32 to vector<16x16xf32>
    %76 = arith.select %64, %74, %75 : vector<16x16xi1>, vector<16x16xf32>
    %cst_35 = arith.constant dense<0.000000e+00> : vector<16xf32>
    %77 = vector.multi_reduction <add>, %76, %cst_35 [1] : vector<16x16xf32> to vector<16xf32>
    %78 = vector.shape_cast %77 : vector<16xf32> to vector<16x1xf32>
    %cst_36 = arith.constant 0.000000e+00 : f32
    %79 = vector.broadcast %cst_36 : f32 to vector<16x1xf32>
    %80 = arith.cmpf ogt, %78, %79 : vector<16x1xf32>
    %cst_37 = arith.constant 1.000000e+00 : f32
    %81 = vector.broadcast %cst_37 : f32 to vector<16x1xf32>
    %82 = arith.select %80, %78, %81 : vector<16x1xi1>, vector<16x1xf32>
    %83 = tpu.reciprocal %82 {approx = true} : vector<16x1xf32> -> vector<16x1xf32>
    %84 = vector.broadcast %83 : vector<16x1xf32> to vector<16x16xf32>
    %85 = arith.mulf %76, %84 : vector<16x16xf32>
    %86 = arith.truncf %85 : vector<16x16xf32> to vector<16x16xbf16>
    %87 = arith.truncf %60 : vector<16x128xf32> to vector<16x128xbf16>
    %cst_38 = arith.constant dense<0.000000e+00> : vector<16x128xf32>
    %88 = tpu.matmul %86, %87, %cst_38 {dimension_numbers = #tpu.dot_dimension_numbers<[1], [0], [0], [1], [0, 0, 1, 1], [], []>} : vector<16x16xbf16>, vector<16x128xbf16>, vector<16x128xf32> -> vector<16x128xf32>
    %89 = arith.addf %88, %58 : vector<16x128xf32>
    %cst_39 = arith.constant 0.000000e+00 : f32
    %90 = vector.broadcast %cst_39 : f32 to vector<16x128xf32>
    %91 = arith.cmpf ogt, %89, %90 : vector<16x128xf32>
    %cst_40 = arith.constant 5.000000e-01 : f32
    %92 = vector.broadcast %cst_40 : f32 to vector<16x128xf32>
    %93 = arith.mulf %92, %89 : vector<16x128xf32>
    %94 = arith.select %91, %89, %93 : vector<16x128xi1>, vector<16x128xf32>
    %95 = arith.truncf %94 : vector<16x128xf32> to vector<16x128xbf16>
    %c0_41 = arith.constant 0 : index
    %c0_42 = arith.constant 0 : index
    %96 = vector.load %arg8[%c0_41, %c0_42] : memref<128x512xbf16, #tpu.memory_space<vmem>>, vector<128x512xbf16>
    %cst_43 = arith.constant dense<0.000000e+00> : vector<16x512xf32>
    %97 = tpu.matmul %95, %96, %cst_43 {dimension_numbers = #tpu.dot_dimension_numbers<[1], [0], [0], [1], [0, 0, 1, 1], [], []>} : vector<16x128xbf16>, vector<128x512xbf16>, vector<16x512xf32> -> vector<16x512xf32>
    %c0_44 = arith.constant 0 : index
    %c0_45 = arith.constant 0 : index
    %98 = vector.load %arg9[%c0_44, %c0_45] : memref<1x512xf32, #tpu.memory_space<vmem>>, vector<1x512xf32>
    %99 = vector.broadcast %98 : vector<1x512xf32> to vector<16x512xf32>
    %100 = arith.addf %97, %99 : vector<16x512xf32>
    %101 = vector.extract_strided_slice %100 {offsets = [0, 0], sizes = [16, 128], strides = [1, 1]} : vector<16x512xf32> to vector<16x128xf32>
    %102 = vector.extract_strided_slice %100 {offsets = [0, 128], sizes = [16, 128], strides = [1, 1]} : vector<16x512xf32> to vector<16x128xf32>
    %103 = vector.extract_strided_slice %100 {offsets = [0, 256], sizes = [16, 128], strides = [1, 1]} : vector<16x512xf32> to vector<16x128xf32>
    %104 = vector.extract_strided_slice %100 {offsets = [0, 384], sizes = [16, 128], strides = [1, 1]} : vector<16x512xf32> to vector<16x128xf32>
    %c0_46 = arith.constant 0 : index
    %c0_47 = arith.constant 0 : index
    %105 = vector.load %arg1[%c0_46, %c0_47] : memref<16x16xi8, #tpu.memory_space<vmem>>, vector<16x16xi8>
    %106 = arith.sitofp %105 : vector<16x16xi8> to vector<16x16xf32>
    %cst_48 = arith.constant 0.000000e+00 : f32
    %107 = vector.broadcast %cst_48 : f32 to vector<16x16xf32>
    %108 = arith.cmpf ogt, %106, %107 : vector<16x16xf32>
    %109 = arith.truncf %101 : vector<16x128xf32> to vector<16x128xbf16>
    %110 = arith.truncf %103 : vector<16x128xf32> to vector<16x128xbf16>
    %cst_49 = arith.constant dense<0.000000e+00> : vector<16x16xf32>
    %111 = tpu.matmul %109, %110, %cst_49 {dimension_numbers = #tpu.dot_dimension_numbers<[1], [1], [0], [0], [0, 0, 1, 0], [], []>} : vector<16x128xbf16>, vector<16x128xbf16>, vector<16x16xf32> -> vector<16x16xf32>
    %cst_50 = arith.constant -1.000000e+30 : f32
    %112 = vector.broadcast %cst_50 : f32 to vector<16x16xf32>
    %113 = arith.select %108, %111, %112 : vector<16x16xi1>, vector<16x16xf32>
    %cst_51 = arith.constant dense<0xFF800000> : vector<16xf32>
    %114 = vector.multi_reduction <maximumf>, %113, %cst_51 [1] : vector<16x16xf32> to vector<16xf32>
    %115 = vector.shape_cast %114 : vector<16xf32> to vector<16x1xf32>
    %116 = vector.broadcast %115 : vector<16x1xf32> to vector<16x16xf32>
    %117 = arith.subf %113, %116 : vector<16x16xf32>
    %118 = math.exp %117 : vector<16x16xf32>
    %cst_52 = arith.constant 0.000000e+00 : f32
    %119 = vector.broadcast %cst_52 : f32 to vector<16x16xf32>
    %120 = arith.select %108, %118, %119 : vector<16x16xi1>, vector<16x16xf32>
    %cst_53 = arith.constant dense<0.000000e+00> : vector<16xf32>
    %121 = vector.multi_reduction <add>, %120, %cst_53 [1] : vector<16x16xf32> to vector<16xf32>
    %122 = vector.shape_cast %121 : vector<16xf32> to vector<16x1xf32>
    %cst_54 = arith.constant 0.000000e+00 : f32
    %123 = vector.broadcast %cst_54 : f32 to vector<16x1xf32>
    %124 = arith.cmpf ogt, %122, %123 : vector<16x1xf32>
    %cst_55 = arith.constant 1.000000e+00 : f32
    %125 = vector.broadcast %cst_55 : f32 to vector<16x1xf32>
    %126 = arith.select %124, %122, %125 : vector<16x1xi1>, vector<16x1xf32>
    %127 = tpu.reciprocal %126 {approx = true} : vector<16x1xf32> -> vector<16x1xf32>
    %128 = vector.broadcast %127 : vector<16x1xf32> to vector<16x16xf32>
    %129 = arith.mulf %120, %128 : vector<16x16xf32>
    %130 = arith.truncf %129 : vector<16x16xf32> to vector<16x16xbf16>
    %131 = arith.truncf %104 : vector<16x128xf32> to vector<16x128xbf16>
    %cst_56 = arith.constant dense<0.000000e+00> : vector<16x128xf32>
    %132 = tpu.matmul %130, %131, %cst_56 {dimension_numbers = #tpu.dot_dimension_numbers<[1], [0], [0], [1], [0, 0, 1, 1], [], []>} : vector<16x16xbf16>, vector<16x128xbf16>, vector<16x128xf32> -> vector<16x128xf32>
    %133 = arith.addf %132, %102 : vector<16x128xf32>
    %cst_57 = arith.constant 0.000000e+00 : f32
    %134 = vector.broadcast %cst_57 : f32 to vector<16x128xf32>
    %135 = arith.cmpf ogt, %133, %134 : vector<16x128xf32>
    %cst_58 = arith.constant 5.000000e-01 : f32
    %136 = vector.broadcast %cst_58 : f32 to vector<16x128xf32>
    %137 = arith.mulf %136, %133 : vector<16x128xf32>
    %138 = arith.select %135, %133, %137 : vector<16x128xi1>, vector<16x128xf32>
    %139 = arith.truncf %138 : vector<16x128xf32> to vector<16x128xbf16>
    %c0_59 = arith.constant 0 : index
    %c0_60 = arith.constant 0 : index
    %140 = vector.load %arg12[%c0_59, %c0_60] : memref<16x128xbf16, #tpu.memory_space<vmem>>, vector<16x128xbf16>
    tpu.vector_store %arg12[%c0_59, %c0_60], %139 {strides = array<i32>} : memref<16x128xbf16, #tpu.memory_space<vmem>>, vector<16x128xbf16>,
    %141 = arith.truncf %138 : vector<16x128xf32> to vector<16x128xbf16>
    %c0_61 = arith.constant 0 : index
    %c0_62 = arith.constant 0 : index
    %142 = vector.load %arg10[%c0_61, %c0_62] : memref<128x128xbf16, #tpu.memory_space<vmem>>, vector<128x128xbf16>
    %cst_63 = arith.constant dense<0.000000e+00> : vector<16x128xf32>
    %143 = tpu.matmul %141, %142, %cst_63 {dimension_numbers = #tpu.dot_dimension_numbers<[1], [0], [0], [1], [0, 0, 1, 1], [], []>} : vector<16x128xbf16>, vector<128x128xbf16>, vector<16x128xf32> -> vector<16x128xf32>
    %c0_64 = arith.constant 0 : index
    %c0_65 = arith.constant 0 : index
    %144 = vector.load %arg11[%c0_64, %c0_65] : memref<1x128xf32, #tpu.memory_space<vmem>>, vector<1x128xf32>
    %145 = vector.broadcast %144 : vector<1x128xf32> to vector<16x128xf32>
    %146 = arith.addf %143, %145 : vector<16x128xf32>
    %c0_66 = arith.constant 0 : index
    %c0_67 = arith.constant 0 : index
    %147 = vector.load %arg13[%c0_66, %c0_67] : memref<16x128xf32, #tpu.memory_space<vmem>>, vector<16x128xf32>
    tpu.vector_store %arg13[%c0_66, %c0_67], %146 {strides = array<i32>} : memref<16x128xf32, #tpu.memory_space<vmem>>, vector<16x128xf32>,
    return
  }
}

</mosaic_0001>

<bundles_post_ra>
// kernel: gig_transformer_forward.1
= control target key start
LH: loop header
LB: loop body
LE: loop exit
PB: predicated region body
PF: predicated region fallthrough
CT: control target
= control target key end

     0   :  { %v2001_v0 = vmov 0.0   ;;  %vm2002_vm0 = vmmov 0   ;;  %v2003_v44 = vmov 0   ;;  %v194_v53 = vlaneseq  ;;  %s2594_s2 = inlined_call_operand.vmem [shape: bf16[128,128], index: 2, kind: input, shape index: {}]   ;;  %s2595_s4 = inlined_call_operand.vmem [shape: bf16[128,512], index: 4, kind: input, shape index: {}]   ;;  %s2596_s0 = inlined_call_operand.vmem [shape: f32[16,128], index: 0, kind: input, shape index: {}]   ;;  %s2597_s3 = inlined_call_operand.vmem [shape: f32[1,128], index: 3, kind: input, shape index: {}, may-alias: {3,11}]   ;;  %s2598_s5 = inlined_call_operand.vmem [shape: f32[1,512], index: 5, kind: input, shape index: {}, may-alias: {5,7,9}]   ;;  %s2599_s1 = inlined_call_operand.vmem [shape: s8[16,16], index: 1, kind: input, shape index: {}]   ;;  %s2600_s6 = inlined_call_operand.vmem [shape: bf16[128,512], index: 6, kind: input, shape index: {}]   ;;  %s2601_s7 = inlined_call_operand.vmem [shape: f32[1,512], index: 7, kind: input, shape index: {}, may-alias: {5,7,9}]   ;;  %s2602_s8 = inlined_call_operand.vmem [shape: bf16[128,512], index: 8, kind: input, shape index: {}]   ;;  %s2603_s9 = inlined_call_operand.vmem [shape: f32[1,512], index: 9, kind: input, shape index: {}, may-alias: {5,7,9}]   ;;  %s2604_s10 = inlined_call_operand.vmem [shape: bf16[128,128], index: 10, kind: input, shape index: {}]   ;;  %s2605_s12 = inlined_call_operand.vmem [shape: bf16[16,128], index: 12, kind: output, shape index: {0}]   ;;  %s2606_s11 = inlined_call_operand.vmem [shape: f32[1,128], index: 11, kind: input, shape index: {}, may-alias: {3,11}]   ;;  %s2607_s13 = inlined_call_operand.vmem [shape: f32[16,128], index: 13, kind: output, shape index: {1}]  }
   0x1   :  { %1738 = vmatprep.subr.bf16.mxu0 %v2001_v0  ;;  %v1817_v1 = vld [vmem:[%s2594_s2] sm:$0xff]   ;;  %1754 = vmatprep.mubr.msk.bf16.mxu0 %vm2002_vm0, %v2001_v0  ;;  %v1818_v2 = vld [vmem:[%s2594_s2 + $0x8] sm:$0xff]   ;;  %v1819_v3 = vld [vmem:[%s2594_s2 + $0x10] sm:$0xff]   ;;  %vm513_vm2 = vcmask 130048  }
   0x2   :  { %1739 = vmatpush3.bf16.msra.mxu0 %v1817_v1  ;;  %v1825_v4 = vld [vmem:[%s2595_s4 + $0x4] ss:$16 sps:$4 sm:$0xff]   ;;  %v1820_v5 = vld [vmem:[%s2594_s2 + $0x18] sm:$0xff]   ;;  %v1830_v6 = vld [vmem:[%s2595_s4] ss:$16 sps:$4 sm:$0xff]   ;;  %406 = vmatprep.mubr.bf16.mxu1 %v2003_v44  ;;  %v2219_v54 = vshrl.u32 %v194_v53, 7 }
   0x3   :  { %1740 = vmatprep.subr.bf16.mxu0 %v2001_v0  ;;  %374 = vmatprep.subr.bf16.mxu1 %v1825_v4  ;;  %v1831_v7 = vld [vmem:[%s2595_s4 + $0x24] ss:$16 sps:$4 sm:$0xff]   ;;  %v1836_v9 = vld [vmem:[%s2595_s4 + $0x20] ss:$16 sps:$4 sm:$0xff]   ;;  %v1822_v12 = vld [vmem:[%s2594_s2 + $0x28] sm:$0xff]  }
   0x4   :  { %v1821_v8 = vld [vmem:[%s2594_s2 + $0x20] sm:$0xff]   ;;  %375 = vmatpush1.bf16.msra.mxu1 %v1830_v6  ;;  %v1823_v14 = vld [vmem:[%s2594_s2 + $0x30] sm:$0xff]   ;;  %v1824_v17 = vld [vmem:[%s2594_s2 + $0x38] sm:$0xff]   ;;  %v2222_v55 = vsub.s32 0, %v2219_v54  ;;  %v2225_v56 = vsub.s32 2, %v2219_v54  ;;  %v2233_v58 = vsub.s32 3, %v2219_v54 }
   0x5   :  { %376 = vmatprep.subr.bf16.mxu1 %v1831_v7  ;;  %v1837_v10 = vld [vmem:[%s2595_s4 + $0x44] ss:$16 sps:$4 sm:$0xff]   ;;  %v1842_v11 = vld [vmem:[%s2595_s4 + $0x40] ss:$16 sps:$4 sm:$0xff]   ;;  %v45_v20 = vld [vmem:[%s2596_s0 + $0x8] sm:$0xff] }
   0x6   :  { %1741 = vmatpush3.bf16.msra.mxu0 %v1818_v2  ;;  %v1843_v13 = vld [vmem:[%s2595_s4 + $0x64] ss:$16 sps:$4 sm:$0xff]   ;;  %v1848_v15 = vld [vmem:[%s2595_s4 + $0x60] ss:$16 sps:$4 sm:$0xff]   ;;  %v1829_v22 = vld [vmem:[%s2595_s4 + $0xc] ss:$16 sps:$4 sm:$0xff]  }
   0x7   :  { %1742 = vmatprep.subr.bf16.mxu0 %v2001_v0  ;;  %v1849_v16 = vld [vmem:[%s2595_s4 + $0x84] ss:$16 sps:$4 sm:$0xff]   ;;  %v1854_v19 = vld [vmem:[%s2595_s4 + $0x80] ss:$16 sps:$4 sm:$0xff]   ;;  %v1827_v25 = vld [vmem:[%s2595_s4 + $0x8] ss:$16 sps:$4 sm:$0xff]  }
   0x8   :  { %377 = vmatpush1.bf16.msra.mxu1 %v1836_v9  ;;  %v44_v18 = vld [vmem:[%s2596_s0] sm:$0xff]  ;;  %v1835_v27 = vld [vmem:[%s2595_s4 + $0x2c] ss:$16 sps:$4 sm:$0xff]   ;;  %v1833_v28 = vld [vmem:[%s2595_s4 + $0x28] ss:$16 sps:$4 sm:$0xff]  }
   0x9   :  { %378 = vmatprep.subr.bf16.mxu1 %v1837_v10  ;;  %v1855_v21 = vld [vmem:[%s2595_s4 + $0xa4] ss:$16 sps:$4 sm:$0xff]   ;;  %v46_v23 = vpack.c.bf16 %v45_v20, %v44_v18  ;;  %v1860_v24 = vld [vmem:[%s2595_s4 + $0xa0] ss:$16 sps:$4 sm:$0xff]   ;;  %v1841_v29 = vld [vmem:[%s2595_s4 + $0x4c] ss:$16 sps:$4 sm:$0xff]  }
   0xa   :  { %1743 = vmatpush3.bf16.msra.mxu0 %v1819_v3  ;;  %v1861_v26 = vld [vmem:[%s2595_s4 + $0xc4] ss:$16 sps:$4 sm:$0xff]   ;;  %v1839_v30 = vld [vmem:[%s2595_s4 + $0x48] ss:$16 sps:$4 sm:$0xff]   ;;  %v1847_v31 = vld [vmem:[%s2595_s4 + $0x6c] ss:$16 sps:$4 sm:$0xff]  }
   0xb   :  { %1744 = vmatprep.subr.bf16.mxu0 %v2001_v0  ;;  %v1845_v32 = vld [vmem:[%s2595_s4 + $0x68] ss:$16 sps:$4 sm:$0xff]   ;;  %v1853_v33 = vld [vmem:[%s2595_s4 + $0x8c] ss:$16 sps:$4 sm:$0xff]   ;;  %v1866_v39 = vld [vmem:[%s2595_s4 + $0xc0] ss:$16 sps:$4 sm:$0xff]  }
   0xc   :  { %379 = vmatpush1.bf16.msra.mxu1 %v1842_v11  ;;  %v1851_v34 = vld [vmem:[%s2595_s4 + $0x88] ss:$16 sps:$4 sm:$0xff]   ;;  %v1859_v35 = vld [vmem:[%s2595_s4 + $0xac] ss:$16 sps:$4 sm:$0xff]   ;;  %v1867_v40 = vld [vmem:[%s2595_s4 + $0xe4] ss:$16 sps:$4 sm:$0xff]  }
   0xd   :  { %380 = vmatprep.subr.bf16.mxu1 %v1843_v13  ;;  %v1857_v36 = vld [vmem:[%s2595_s4 + $0xa8] ss:$16 sps:$4 sm:$0xff]   ;;  %v1865_v37 = vld [vmem:[%s2595_s4 + $0xcc] ss:$16 sps:$4 sm:$0xff]   ;;  %v1872_v43 = vld [vmem:[%s2595_s4 + $0xe0] ss:$16 sps:$4 sm:$0xff]  }
   0xe   :  { %1745 = vmatpush3.bf16.msra.mxu0 %v1820_v5  ;;  %v1863_v38 = vld [vmem:[%s2595_s4 + $0xc8] ss:$16 sps:$4 sm:$0xff]   ;;  %v1871_v41 = vld [vmem:[%s2595_s4 + $0xec] ss:$16 sps:$4 sm:$0xff]   ;;  %v1578_v45 = vld [vmem:[%s2597_s3] ss:$0 sm:$0xff] }
   0xf   :  { %1746 = vmatprep.subr.bf16.mxu0 %v2001_v0  ;;  %v1869_v42 = vld [vmem:[%s2595_s4 + $0xe8] ss:$16 sps:$4 sm:$0xff]   ;;  %v2230_v57 = vld [vmem:[%s2598_s5] sm:$0xf]  ;;  %v1908_v53 = vld [vmem:[%s2600_s6 + $0xac] ss:$16 sps:$4 sm:$0xff]  }
  0x10   :  { %381 = vmatpush1.bf16.msra.mxu1 %v1848_v15  ;;  %v197_v59 = vrot.slane %v2230_v57, %v2222_v55  ;;  %v205_v60 = vrot.slane %v2230_v57, %v2225_v56  ;;  %v209_v63 = vrot.slane %v2230_v57, %v2233_v58 }
  0x11   :  { %382 = vmatprep.subr.bf16.mxu1 %v1849_v16  ;;  %v1705_v16 = vld [vmem:[%s2599_s1] sm:$0xf]  }
  0x12   :  { %1747 = vmatpush3.bf16.msra.mxu0 %v1821_v8  ;;  %v1707_v18 = vunpack.c.1.s8 %v1705_v16 }
  0x13   :  { %1748 = vmatprep.subr.bf16.mxu0 %v2001_v0 }
  0x14   :  { %383 = vmatpush1.bf16.msra.mxu1 %v1854_v19  ;;  %v2253_v20 = vcvt.s32.f32 %v1707_v18  ;;  %v1903_v18 = vld [vmem:[%s2600_s6 + $0xa0] ss:$16 sps:$4 sm:$0xff]  }
  0x15   :  { %384 = vmatprep.subr.bf16.mxu1 %v1855_v21 }
  0x16   :  { %1749 = vmatpush3.bf16.msra.mxu0 %v1822_v12  ;;  %vm467_vm3 = vcmp.gt.f32.partialorder %v2253_v20, 0.0  ;;  %v1972_v20 = vld [vmem:[%s2604_s10 + $0x18] sm:$0xff]  }
  0x17   :  { %1750 = vmatprep.subr.bf16.mxu0 %v2001_v0 }
  0x18   :  { %385 = vmatpush1.bf16.msra.mxu1 %v1860_v24 }
  0x19   :  { %386 = vmatprep.subr.bf16.mxu1 %v1861_v26 }
  0x1a   :  { %1751 = vmatpush3.bf16.msra.mxu0 %v1823_v14 }
  0x1b   :  { %1752 = vmatprep.subr.bf16.mxu0 %v2001_v0 }
  0x1c   :  { %387 = vmatpush1.bf16.msra.mxu1 %v1866_v39 }
  0x1d   :  { %388 = vmatprep.subr.bf16.mxu1 %v1867_v40 }
  0x1e   :  { %1753 = vmatpush3.bf16.msra.mxu0 %v1824_v17  ;;  %v1706_v17 = vunpack.c.0.s8 %v1705_v16  ;;  %v1897_v16 = vld [vmem:[%s2600_s6 + $0x80] ss:$16 sps:$4 sm:$0xff]  }
  0x1f   :  { %417 = vmatprep.subr.bf16.mxu0 %v1829_v22 }
  0x20   :  { %389 = vmatpush1.bf16.msra.mxu1 %v1872_v43  ;;  %v2251_v19 = vcvt.s32.f32 %v1706_v17  ;;  %v1878_v43 = vld [vmem:[%s2600_s6 + $0xc] ss:$16 sps:$4 sm:$0xff]   ;;  %v1905_v17 = vld [vmem:[%s2600_s6 + $0xa4] ss:$16 sps:$4 sm:$0xff]  }
  0x21   :  { %1755 = vmatmul.mubr.bf16.vlgmr.msra.gmra.mrb[0].mxu0 %v46_v23  ;;  %1758 = vmatprep.subr.bf16.mxu1 %v2001_v0 }
  0x22   :  { %418 = vmatpush1.bf16.msra.mxu0 %v1827_v25  ;;  %449 = vmatprep.mubr.bf16.mxu0 %v2003_v44  ;;  %vm466_vm1 = vcmp.gt.f32.partialorder %v2251_v19, 0.0  ;;  %v1970_v19 = vld [vmem:[%s2604_s10 + $0x8] sm:$0xff]  }
  0x23   :  { %419 = vmatprep.subr.bf16.mxu0 %v1835_v27 }
  0x26   :  { %420 = vmatpush1.bf16.msra.mxu0 %v1833_v28 }
  0x27   :  { %421 = vmatprep.subr.bf16.mxu0 %v1841_v29 }
  0x2a   :  { %422 = vmatpush1.bf16.msra.mxu0 %v1839_v30 }
  0x2b   :  { %423 = vmatprep.subr.bf16.mxu0 %v1847_v31 }
  0x2e   :  { %424 = vmatpush1.bf16.msra.mxu0 %v1845_v32 }
  0x2f   :  { %425 = vmatprep.subr.bf16.mxu0 %v1853_v33 }
  0x32   :  { %426 = vmatpush1.bf16.msra.mxu0 %v1851_v34 }
  0x33   :  { %427 = vmatprep.subr.bf16.mxu0 %v1859_v35 }
  0x36   :  { %428 = vmatpush1.bf16.msra.mxu0 %v1857_v36 }
  0x37   :  { %429 = vmatprep.subr.bf16.mxu0 %v1865_v37 }
  0x3a   :  { %430 = vmatpush1.bf16.msra.mxu0 %v1863_v38 }
  0x3b   :  { %431 = vmatprep.subr.bf16.mxu0 %v1871_v41  ;;  %v1875_v41 = vld [vmem:[%s2600_s6 + $0x4] ss:$16 sps:$4 sm:$0xff]  }
  0x3e   :  { %432 = vmatpush1.bf16.msra.mxu0 %v1869_v42  ;;  %v1876_v42 = vld [vmem:[%s2600_s6 + $0x8] ss:$16 sps:$4 sm:$0xff]  }
  0x3f   :  { %852 = vmatprep.subr.bf16.mxu0 %v1878_v43 }
  0xf4   :  { %v152_v46 = vpop.f32.mrb[0].mxu0 }
  0xf5   :  { %v1756_v47 = vpop.f32.mrb[1].mxu0  ;;  %v153_v49 = vadd.f32 %v1578_v45, %v152_v46  ;;  %v1884_v46 = vld [vmem:[%s2600_s6 + $0x2c] ss:$16 sps:$4 sm:$0xff]  }
  0xf6   :  { %v155_v48 = vpop.f32.mrb[2].mxu0  ;;  %v1890_v47 = vld [vmem:[%s2600_s6 + $0x4c] ss:$16 sps:$4 sm:$0xff]  }
  0xf7   :  { %v156_v50 = vadd.f32 %v1578_v45, %v155_v48  ;;  %v1757_v51 = vpop.f32.mrb[3].mxu0  ;;  %v1882_v45 = vld [vmem:[%s2600_s6 + $0x28] ss:$16 sps:$4 sm:$0xff]  }
  0xf8   :  { %v1888_v48 = vld [vmem:[%s2600_s6 + $0x48] ss:$16 sps:$4 sm:$0xff]   ;;  %v1902_v51 = vld [vmem:[%s2600_s6 + $0x8c] ss:$16 sps:$4 sm:$0xff]  }
  0xf9   :  { %v159_v52 = vpack.c.bf16 %v156_v50, %v153_v49  ;;  %v1896_v49 = vld [vmem:[%s2600_s6 + $0x6c] ss:$16 sps:$4 sm:$0xff]   ;;  %v1894_v50 = vld [vmem:[%s2600_s6 + $0x68] ss:$16 sps:$4 sm:$0xff]  }
  0xfb   :  { %407 = vmatmul.mubr.bf16.vlgmr.msra.gmra.mrb[0].mxu1 %v159_v52  ;;  %450 = vmatmul.mubr.bf16.vlgmr.msra.gmra.mrb[4].mxu0 %v159_v52  ;;  %v1900_v52 = vld [vmem:[%s2600_s6 + $0x88] ss:$16 sps:$4 sm:$0xff]  }
  0xfc   :  { %1760 = vmatprep.mubr.msk.bf16.mxu1 %vm2002_vm0, %v2001_v0  ;;  %884 = vmatprep.mubr.bf16.mxu0 %v2003_v44 }
  0xfd   :  { %853 = vmatpush1.bf16.msra.mxu0 %v1876_v42 }
  0xfe   :  { %854 = vmatprep.subr.bf16.mxu0 %v1884_v46 }
 0x101   :  { %855 = vmatpush1.bf16.msra.mxu0 %v1882_v45 }
 0x102   :  { %856 = vmatprep.subr.bf16.mxu0 %v1890_v47 }
 0x105   :  { %857 = vmatpush1.bf16.msra.mxu0 %v1888_v48 }
 0x106   :  { %858 = vmatprep.subr.bf16.mxu0 %v1896_v49 }
 0x109   :  { %859 = vmatpush1.bf16.msra.mxu0 %v1894_v50 }
 0x10a   :  { %860 = vmatprep.subr.bf16.mxu0 %v1902_v51 }
 0x10d   :  { %861 = vmatpush1.bf16.msra.mxu0 %v1900_v52 }
 0x10e   :  { %862 = vmatprep.subr.bf16.mxu0 %v1908_v53 }
 0x1ce   :  { %v408_v61 = vpop.f32.mrb[0].mxu1  ;;  %v451_v62 = vpop.f32.mrb[4].mxu0 }
 0x1cf   :  { %v2241_v1 = vpop.f32.mrb[1].mxu1  ;;  %v453_v2 = vpop.f32.mrb[5].mxu0  ;;  %v409_v5 = vadd.f32 %v408_v61, %v197_v59  ;;  %v452_v6 = vadd.f32 %v451_v62, %v205_v60 }
 0x1d0   :  { %v412_v3 = vpop.f32.mrb[2].mxu1  ;;  %v455_v4 = vpop.f32.mrb[6].mxu0  ;;  %v454_v11 = vadd.f32 %v453_v2, %v209_v63 }
 0x1d1   :  { %v413_v7 = vadd.f32 %v412_v3, %v197_v59  ;;  %v456_v8 = vadd.f32 %v455_v4, %v205_v60  ;;  %v2243_v9 = vpop.f32.mrb[3].mxu1  ;;  %v457_v10 = vpop.f32.mrb[7].mxu0  ;;  %v1906_v59 = vld [vmem:[%s2600_s6 + $0xa8] ss:$16 sps:$4 sm:$0xff]  }
 0x1d2   :  { %v458_v12 = vadd.f32 %v457_v10, %v209_v63  ;;  %863 = vmatpush1.bf16.msra.mxu0 %v1906_v59  ;;  %v1879_v10 = vld [vmem:[%s2600_s6 + $0x20] ss:$16 sps:$4 sm:$0xff]  }
 0x1d3   :  { %v468_v13 = vpack.c.bf16 %v413_v7, %v409_v5  ;;  %v469_v14 = vpack.c.bf16 %v456_v8, %v452_v6  ;;  %v1873_v6 = vld [vmem:[%s2600_s6] ss:$16 sps:$4 sm:$0xff]   ;;  %v1881_v8 = vld [vmem:[%s2600_s6 + $0x24] ss:$16 sps:$4 sm:$0xff]  }
 0x1d4   :  { %v543_v15 = vpack.c.bf16 %v458_v12, %v454_v11  ;;  %v1887_v11 = vld [vmem:[%s2600_s6 + $0x44] ss:$16 sps:$4 sm:$0xff]   ;;  %v1885_v12 = vld [vmem:[%s2600_s6 + $0x40] ss:$16 sps:$4 sm:$0xff]  }
 0x1d5   :  { %1759 = vmatpush3.bf16.xpose.msra.mxu1 %v469_v14  ;;  %v1891_v14 = vld [vmem:[%s2600_s6 + $0x60] ss:$16 sps:$4 sm:$0xff]  }
 0x1d6   :  { %1764 = vmatprep.subr.bf16.mxu1 %v2001_v0 }
 0x1dc   :  { %1761 = vmatmul.mubr.bf16.vlgmr.msra.gmra.mrb[4].mxu1 %v468_v13  ;;  %v1893_v13 = vld [vmem:[%s2600_s6 + $0x64] ss:$16 sps:$4 sm:$0xff]  }
 0x1dd   :  { %1765 = vmatpush3.bf16.msra.mxu1 %v543_v15  ;;  %1766 = vmatprep.mubr.msk.bf16.mxu1 %vm2002_vm0, %v2001_v0  ;;  %v1899_v15 = vld [vmem:[%s2600_s6 + $0x84] ss:$16 sps:$4 sm:$0xff]  }
 0x1de   :  { %809 = vmatprep.subr.bf16.mxu1 %v1875_v41 }
 0x2af   :  { %v504_v21 = vpop.f32.mrb[4].mxu1 }
 0x2b0   :  { %v511_v22 = vsel %vm466_vm1, %v504_v21, -1e+30  ;;  %v1762_v23 = vpop.f32.mrb[5].mxu1  ;;  %v1911_v21 = vld [vmem:[%s2600_s6 + $0xc4] ss:$16 sps:$4 sm:$0xff]  }
 0x2b1   :  { %v507_v24 = vpop.f32.mrb[6].mxu1  ;;  %v514_v25 = vsel %vm513_vm2, %v511_v22, -inf  ;;  %v1909_v23 = vld [vmem:[%s2600_s6 + $0xc0] ss:$16 sps:$4 sm:$0xff]  }
 0x2b2   :  { %v512_v26 = vsel %vm467_vm3, %v507_v24, -1e+30  ;;  %515 = vmax.xlane.f32.xlu0 %v514_v25  ;;  %v1763_v27 = vpop.f32.mrb[7].mxu1  ;;  %v1912_v24 = vld [vmem:[%s2600_s6 + $0xc8] ss:$16 sps:$4 sm:$0xff]  }
 0x2b3   :  { %v517_v28 = vsel %vm513_vm2, %v512_v26, -inf  ;;  %v1917_v25 = vld [vmem:[%s2600_s6 + $0xe4] ss:$16 sps:$4 sm:$0xff]   ;;  %v1915_v27 = vld [vmem:[%s2600_s6 + $0xe0] ss:$16 sps:$4 sm:$0xff]  }
 0x2b6   :  { %518 = vmax.xlane.f32.xlu0 %v517_v28  ;;  %v1918_v28 = vld [vmem:[%s2600_s6 + $0xe8] ss:$16 sps:$4 sm:$0xff]  }
 0x33f   :  { %v516_v29 = vpop.xlane.xlu0 %515 }
 0x340   :  { %v520_v30 = vsub.f32 %v511_v22, %v516_v29  ;;  %v1914_v22 = vld [vmem:[%s2600_s6 + $0xcc] ss:$16 sps:$4 sm:$0xff]   ;;  %v2369_v29 = vsub.s32 1, %v2219_v54 }
 0x341   :  { %864 = vmatprep.subr.bf16.mxu0 %v1914_v22 }
 0x342   :  { %v522_v31 = vmul.f32 1.442695, %v520_v30  ;;  %865 = vmatpush1.bf16.msra.mxu0 %v1912_v24  ;;  %v201_v30 = vrot.slane %v2230_v57, %v2369_v29  ;;  %v2381_v57 = vld [vmem:[%s2601_s7] sm:$0xf] }
 0x343   :  { %v519_v32 = vpop.xlane.xlu0 %518  ;;  %v644_v46 = vrot.slane %v2381_v57, %v2233_v58 }
 0x344   :  { %1977 = vpow2.f32 %v522_v31  ;;  %v521_v33 = vsub.f32 %v512_v26, %v519_v32  ;;  %v1920_v26 = vld [vmem:[%s2600_s6 + $0xec] ss:$16 sps:$4 sm:$0xff]   ;;  %v411_v31 = vadd.f32 %v2241_v1, %v201_v30  ;;  %v632_v1 = vrot.slane %v2381_v57, %v2222_v55 }
 0x345   :  { %866 = vmatprep.subr.bf16.mxu0 %v1920_v26 }
 0x346   :  { %v524_v34 = vmul.f32 1.442695, %v521_v33  ;;  %867 = vmatpush1.bf16.msra.mxu0 %v1918_v28  ;;  %v415_v33 = vadd.f32 %v2243_v9, %v201_v30  ;;  %v640_v9 = vrot.slane %v2381_v57, %v2225_v56  ;;  %v1921_v28 = vld [vmem:[%s2602_s8] ss:$16 sps:$4 sm:$0xff]   ;;  %v1923_v30 = vld [vmem:[%s2602_s8 + $0x4] ss:$16 sps:$4 sm:$0xff]  }
 0x347   :  { %1235 = vmatprep.subr.bf16.mxu0 %v1923_v30 }
 0x348   :  { %1979 = vpow2.f32 %v524_v34 }
 0x34e   :  { %v1978_v35 = vpop.eup %1977 }
 0x34f   :  { %v526_v36 = vsel %vm466_vm1, %v1978_v35, 0.0 }
 0x350   :  { %v528_v37 = vsel %vm513_vm2, %v526_v36, 0.0 }
 0x351   :  { %529 = vadd.xlane.f32.xlu1 %v528_v37 }
 0x352   :  { %v1980_v38 = vpop.eup %1979 }
 0x353   :  { %v527_v39 = vsel %vm467_vm3, %v1980_v38, 0.0 }
 0x354   :  { %v531_v40 = vsel %vm513_vm2, %v527_v39, 0.0 }
 0x355   :  { %532 = vadd.xlane.f32.xlu1 %v531_v40 }
 0x3de   :  { %v530_v60 = vpop.xlane.xlu1 %529 }
 0x3df   :  { %vm534_vm4 = vcmp.gt.f32.partialorder %v530_v60, 0.0 }
 0x3e0   :  { %v536_v61 = vsel %vm534_vm4, %v530_v60, 1.0 }
 0x3e1   :  { %1981 = vrcp.f32 %v536_v61 }
 0x3e2   :  { %v533_v62 = vpop.xlane.xlu1 %532 }
 0x3e3   :  { %vm535_vm5 = vcmp.gt.f32.partialorder %v533_v62, 0.0 }
 0x3e4   :  { %v537_v63 = vsel %vm535_vm5, %v533_v62, 1.0 }
 0x3e5   :  { %1983 = vrcp.f32 %v537_v63 }
 0x3eb   :  { %v1982_v2 = vpop.eup %1981 }
 0x3ec   :  { %v540_v4 = vmul.f32 %v1982_v2, %v526_v36 }
 0x3ef   :  { %v1984_v3 = vpop.eup %1983 }
 0x3f0   :  { %v541_v5 = vmul.f32 %v1984_v3, %v527_v39 }
 0x3f2   :  { %v542_v7 = vpack.c.bf16 %v541_v5, %v540_v4 }
 0x3f4   :  { %1767 = vmatmul.mubr.msk.bf16.vlgmr.msra.gmra.mrb[8].mxu1 %vm513_vm2, %v542_v7 }
 0x3f5   :  { %810 = vmatpush1.bf16.msra.mxu1 %v1873_v6  ;;  %841 = vmatprep.mubr.bf16.mxu1 %v2003_v44 }
 0x3f6   :  { %811 = vmatprep.subr.bf16.mxu1 %v1881_v8 }
 0x3f9   :  { %812 = vmatpush1.bf16.msra.mxu1 %v1879_v10 }
 0x3fa   :  { %813 = vmatprep.subr.bf16.mxu1 %v1887_v11 }
 0x3fd   :  { %814 = vmatpush1.bf16.msra.mxu1 %v1885_v12 }
 0x3fe   :  { %815 = vmatprep.subr.bf16.mxu1 %v1893_v13 }
 0x401   :  { %816 = vmatpush1.bf16.msra.mxu1 %v1891_v14 }
 0x402   :  { %817 = vmatprep.subr.bf16.mxu1 %v1899_v15 }
 0x405   :  { %818 = vmatpush1.bf16.msra.mxu1 %v1897_v16 }
 0x406   :  { %819 = vmatprep.subr.bf16.mxu1 %v1905_v17 }
 0x409   :  { %820 = vmatpush1.bf16.msra.mxu1 %v1903_v18 }
 0x40a   :  { %821 = vmatprep.subr.bf16.mxu1 %v1911_v21 }
 0x40d   :  { %822 = vmatpush1.bf16.msra.mxu1 %v1909_v23 }
 0x40e   :  { %823 = vmatprep.subr.bf16.mxu1 %v1917_v25 }
 0x411   :  { %824 = vmatpush1.bf16.msra.mxu1 %v1915_v27 }
 0x412   :  { %1770 = vmatprep.subr.bf16.mxu1 %v2001_v0 }
 0x4c7   :  { %v581_v32 = vpop.f32.mrb[8].mxu1 }
 0x4c8   :  { %v582_v34 = vadd.f32 %v581_v32, %v411_v31  ;;  %v1768_v35 = vpop.f32.mrb[9].mxu1  ;;  %v1926_v31 = vld [vmem:[%s2602_s8 + $0xc] ss:$16 sps:$4 sm:$0xff]   ;;  %v1929_v32 = vld [vmem:[%s2602_s8 + $0x24] ss:$16 sps:$4 sm:$0xff]  }
 0x4c9   :  { %v584_v36 = vpop.f32.mrb[10].mxu1  ;;  %v1933_v35 = vld [vmem:[%s2602_s8 + $0x40] ss:$16 sps:$4 sm:$0xff]  }
 0x4ca   :  { %v590_v37 = vmul.f32 0.5, %v582_v34  ;;  %v585_v38 = vadd.f32 %v584_v36, %v415_v33  ;;  %v1769_v39 = vpop.f32.mrb[11].mxu1  ;;  %vm588_vm6 = vcmp.gt.f32.partialorder %v582_v34, 0.0  ;;  %v1927_v33 = vld [vmem:[%s2602_s8 + $0x20] ss:$16 sps:$4 sm:$0xff]  }
 0x4cb   :  { %v1941_v36 = vld [vmem:[%s2602_s8 + $0x64] ss:$16 sps:$4 sm:$0xff]   ;;  %v1945_v39 = vld [vmem:[%s2602_s8 + $0x80] ss:$16 sps:$4 sm:$0xff]  }
 0x4cc   :  { %vm589_vm7 = vcmp.gt.f32.partialorder %v585_v38, 0.0  ;;  %v591_v40 = vmul.f32 0.5, %v585_v38  ;;  %v592_v41 = vsel %vm588_vm6, %v582_v34, %v590_v37  ;;  %v1935_v34 = vld [vmem:[%s2602_s8 + $0x44] ss:$16 sps:$4 sm:$0xff]   ;;  %v1939_v37 = vld [vmem:[%s2602_s8 + $0x60] ss:$16 sps:$4 sm:$0xff]  }
 0x4ce   :  { %v593_v54 = vsel %vm589_vm7, %v585_v38, %v591_v40  ;;  %v1947_v38 = vld [vmem:[%s2602_s8 + $0x84] ss:$16 sps:$4 sm:$0xff]  }
 0x4cf   :  { %v594_v42 = vpack.c.bf16 %v593_v54, %v592_v41  ;;  %v1953_v40 = vld [vmem:[%s2602_s8 + $0xa4] ss:$16 sps:$4 sm:$0xff]   ;;  %v1951_v41 = vld [vmem:[%s2602_s8 + $0xa0] ss:$16 sps:$4 sm:$0xff]  }
 0x4d1   :  { %842 = vmatmul.mubr.bf16.vlgmr.msra.gmra.mrb[12].mxu1 %v594_v42  ;;  %885 = vmatmul.mubr.bf16.vlgmr.msra.gmra.mrb[8].mxu0 %v594_v42 }
 0x4d2   :  { %1772 = vmatprep.mubr.msk.bf16.mxu1 %vm2002_vm0, %v2001_v0  ;;  %1267 = vmatprep.mubr.bf16.mxu0 %v2003_v44 }
 0x4d3   :  { %1236 = vmatpush1.bf16.msra.mxu0 %v1921_v28 }
 0x4d4   :  { %1237 = vmatprep.subr.bf16.mxu0 %v1929_v32 }
 0x4d7   :  { %1238 = vmatpush1.bf16.msra.mxu0 %v1927_v33 }
 0x4d8   :  { %1239 = vmatprep.subr.bf16.mxu0 %v1935_v34 }
 0x4db   :  { %1240 = vmatpush1.bf16.msra.mxu0 %v1933_v35 }
 0x4dc   :  { %1241 = vmatprep.subr.bf16.mxu0 %v1941_v36 }
 0x4df   :  { %1242 = vmatpush1.bf16.msra.mxu0 %v1939_v37 }
 0x4e0   :  { %1243 = vmatprep.subr.bf16.mxu0 %v1947_v38 }
 0x4e3   :  { %1244 = vmatpush1.bf16.msra.mxu0 %v1945_v39 }
 0x4e4   :  { %1245 = vmatprep.subr.bf16.mxu0 %v1953_v40 }
 0x4e7   :  { %1246 = vmatpush1.bf16.msra.mxu0 %v1951_v41 }
 0x5a4   :  { %v843_v43 = vpop.f32.mrb[12].mxu1  ;;  %v886_v45 = vpop.f32.mrb[8].mxu0 }
 0x5a5   :  { %v2389_v47 = vpop.f32.mrb[13].mxu1  ;;  %v888_v48 = vpop.f32.mrb[9].mxu0  ;;  %v844_v51 = vadd.f32 %v843_v43, %v632_v1  ;;  %v887_v52 = vadd.f32 %v886_v45, %v640_v9 }
 0x5a6   :  { %v847_v49 = vpop.f32.mrb[14].mxu1  ;;  %v890_v50 = vpop.f32.mrb[10].mxu0  ;;  %v889_v62 = vadd.f32 %v888_v48, %v644_v46 }
 0x5a7   :  { %v848_v53 = vadd.f32 %v847_v49, %v632_v1  ;;  %v891_v59 = vadd.f32 %v890_v50, %v640_v9  ;;  %v2391_v60 = vpop.f32.mrb[15].mxu1  ;;  %v892_v61 = vpop.f32.mrb[11].mxu0  ;;  %v1924_v49 = vld [vmem:[%s2602_s8 + $0x8] ss:$16 sps:$4 sm:$0xff]  }
 0x5a8   :  { %v893_v63 = vadd.f32 %v892_v61, %v644_v46  ;;  %v1944_v61 = vld [vmem:[%s2602_s8 + $0x6c] ss:$16 sps:$4 sm:$0xff]  }
 0x5a9   :  { %v895_v2 = vpack.c.bf16 %v848_v53, %v844_v51  ;;  %v896_v3 = vpack.c.bf16 %v891_v59, %v887_v52  ;;  %v1932_v51 = vld [vmem:[%s2602_s8 + $0x2c] ss:$16 sps:$4 sm:$0xff]   ;;  %v1930_v52 = vld [vmem:[%s2602_s8 + $0x28] ss:$16 sps:$4 sm:$0xff]  }
 0x5aa   :  { %v969_v4 = vpack.c.bf16 %v893_v63, %v889_v62  ;;  %v1938_v53 = vld [vmem:[%s2602_s8 + $0x4c] ss:$16 sps:$4 sm:$0xff]   ;;  %v1936_v59 = vld [vmem:[%s2602_s8 + $0x48] ss:$16 sps:$4 sm:$0xff]  }
 0x5ab   :  { %1771 = vmatpush3.bf16.xpose.msra.mxu1 %v896_v3  ;;  %v1950_v62 = vld [vmem:[%s2602_s8 + $0x8c] ss:$16 sps:$4 sm:$0xff]   ;;  %v1948_v63 = vld [vmem:[%s2602_s8 + $0x88] ss:$16 sps:$4 sm:$0xff]  }
 0x5ac   :  { %1776 = vmatprep.subr.bf16.mxu1 %v2001_v0  ;;  %v1954_v3 = vld [vmem:[%s2602_s8 + $0xa8] ss:$16 sps:$4 sm:$0xff]  }
 0x5b2   :  { %1773 = vmatmul.mubr.bf16.vlgmr.msra.gmra.mrb[16].mxu1 %v895_v2  ;;  %v1956_v2 = vld [vmem:[%s2602_s8 + $0xac] ss:$16 sps:$4 sm:$0xff]  }
 0x5b3   :  { %1777 = vmatpush3.bf16.msra.mxu1 %v969_v4  ;;  %1778 = vmatprep.mubr.msk.bf16.mxu1 %vm2002_vm0, %v2001_v0  ;;  %v1959_v4 = vld [vmem:[%s2602_s8 + $0xc4] ss:$16 sps:$4 sm:$0xff]  }
 0x5b4   :  { %1278 = vmatprep.subr.bf16.mxu1 %v1926_v31  ;;  %1247 = vmatprep.subr.bf16.mxu0 %v1959_v4 }
 0x685   :  { %v931_v5 = vpop.f32.mrb[16].mxu1 }
 0x686   :  { %v938_v6 = vsel %vm466_vm1, %v931_v5, -1e+30  ;;  %v1774_v7 = vpop.f32.mrb[17].mxu1  ;;  %v1962_v5 = vld [vmem:[%s2602_s8 + $0xcc] ss:$16 sps:$4 sm:$0xff]  }
 0x687   :  { %v934_v8 = vpop.f32.mrb[18].mxu1  ;;  %v940_v10 = vsel %vm513_vm2, %v938_v6, -inf  ;;  %v1960_v7 = vld [vmem:[%s2602_s8 + $0xc8] ss:$16 sps:$4 sm:$0xff]  }
 0x688   :  { %v939_v11 = vsel %vm467_vm3, %v934_v8, -1e+30  ;;  %941 = vmax.xlane.f32.xlu0 %v940_v10  ;;  %v1775_v12 = vpop.f32.mrb[19].mxu1  ;;  %v1965_v8 = vld [vmem:[%s2602_s8 + $0xe4] ss:$16 sps:$4 sm:$0xff]  }
 0x689   :  { %v943_v13 = vsel %vm513_vm2, %v939_v11, -inf  ;;  %v1968_v10 = vld [vmem:[%s2602_s8 + $0xec] ss:$16 sps:$4 sm:$0xff]   ;;  %v1966_v12 = vld [vmem:[%s2602_s8 + $0xe8] ss:$16 sps:$4 sm:$0xff]  }
 0x68a   :  { %944 = vmax.xlane.f32.xlu1 %v943_v13  ;;  %v636_v13 = vrot.slane %v2381_v57, %v2369_v29  ;;  %v2519_v57 = vld [vmem:[%s2603_s9] sm:$0xf] }
 0x68b   :  { %v1070_v32 = vrot.slane %v2519_v57, %v2233_v58 }
 0x715   :  { %v942_v14 = vpop.xlane.xlu0 %941 }
 0x716   :  { %v946_v15 = vsub.f32 %v938_v6, %v942_v14  ;;  %v1957_v6 = vld [vmem:[%s2602_s8 + $0xc0] ss:$16 sps:$4 sm:$0xff]   ;;  %v846_v14 = vadd.f32 %v2389_v47, %v636_v13  ;;  %v1058_v47 = vrot.slane %v2519_v57, %v2222_v55 }
 0x717   :  { %v945_v16 = vpop.xlane.xlu1 %944  ;;  %1248 = vmatpush1.bf16.msra.mxu0 %v1957_v6 }
 0x718   :  { %v948_v17 = vmul.f32 1.442695, %v946_v15  ;;  %v947_v18 = vsub.f32 %v939_v11, %v945_v16  ;;  %v1963_v11 = vld [vmem:[%s2602_s8 + $0xe0] ss:$16 sps:$4 sm:$0xff]   ;;  %1249 = vmatprep.subr.bf16.mxu0 %v1965_v8  ;;  %v850_v16 = vadd.f32 %v2391_v60, %v636_v13  ;;  %v1066_v60 = vrot.slane %v2519_v57, %v2225_v56 }
 0x719   :  { %v1971_v8 = vld [vmem:[%s2604_s10 + $0x10] sm:$0xff]  }
 0x71a   :  { %1985 = vpow2.f32 %v948_v17  ;;  %v950_v21 = vmul.f32 1.442695, %v947_v18 }
 0x71b   :  { %1250 = vmatpush1.bf16.msra.mxu0 %v1963_v11  ;;  %v1974_v11 = vld [vmem:[%s2604_s10 + $0x28] sm:$0xff]  }
 0x71c   :  { %1987 = vpow2.f32 %v950_v21  ;;  %1794 = vmatprep.subr.bf16.mxu0 %v2001_v0 }
 0x724   :  { %v1986_v22 = vpop.eup %1985 }
 0x725   :  { %v952_v23 = vsel %vm466_vm1, %v1986_v22, 0.0 }
 0x726   :  { %v1988_v24 = vpop.eup %1987  ;;  %v954_v25 = vsel %vm513_vm2, %v952_v23, 0.0 }
 0x727   :  { %955 = vadd.xlane.f32.xlu0 %v954_v25  ;;  %v953_v26 = vsel %vm467_vm3, %v1988_v24, 0.0 }
 0x728   :  { %v957_v27 = vsel %vm513_vm2, %v953_v26, 0.0 }
 0x729   :  { %958 = vadd.xlane.f32.xlu1 %v957_v27 }
 0x7b4   :  { %v956_v54 = vpop.xlane.xlu0 %955 }
 0x7b5   :  { %vm960_vm8 = vcmp.gt.f32.partialorder %v956_v54, 0.0 }
 0x7b6   :  { %v962_v42 = vsel %vm960_vm8, %v956_v54, 1.0  ;;  %v959_v1 = vpop.xlane.xlu1 %958 }
 0x7b7   :  { %1989 = vrcp.f32 %v962_v42  ;;  %vm961_vm9 = vcmp.gt.f32.partialorder %v959_v1, 0.0 }
 0x7b8   :  { %v963_v9 = vsel %vm961_vm9, %v959_v1, 1.0 }
 0x7b9   :  { %1991 = vrcp.f32 %v963_v9 }
 0x7c1   :  { %v1990_v43 = vpop.eup %1989 }
 0x7c2   :  { %v966_v46 = vmul.f32 %v1990_v43, %v952_v23 }
 0x7c3   :  { %v1992_v45 = vpop.eup %1991 }
 0x7c4   :  { %v967_v48 = vmul.f32 %v1992_v45, %v953_v26 }
 0x7c6   :  { %v968_v50 = vpack.c.bf16 %v967_v48, %v966_v46 }
 0x7c8   :  { %1779 = vmatmul.mubr.msk.bf16.vlgmr.msra.gmra.mrb[20].mxu1 %vm513_vm2, %v968_v50 }
 0x7c9   :  { %1279 = vmatpush1.bf16.msra.mxu1 %v1924_v49  ;;  %1310 = vmatprep.mubr.bf16.mxu1 %v2003_v44  ;;  %v1942_v44 = vld [vmem:[%s2602_s8 + $0x68] ss:$16 sps:$4 sm:$0xff]  }
 0x7ca   :  { %1280 = vmatprep.subr.bf16.mxu1 %v1932_v51 }
 0x7cd   :  { %1281 = vmatpush1.bf16.msra.mxu1 %v1930_v52 }
 0x7ce   :  { %1282 = vmatprep.subr.bf16.mxu1 %v1938_v53 }
 0x7d1   :  { %1283 = vmatpush1.bf16.msra.mxu1 %v1936_v59 }
 0x7d2   :  { %1284 = vmatprep.subr.bf16.mxu1 %v1944_v61 }
 0x7d5   :  { %1285 = vmatpush1.bf16.msra.mxu1 %v1942_v44 }
 0x7d6   :  { %1286 = vmatprep.subr.bf16.mxu1 %v1950_v62 }
 0x7d9   :  { %1287 = vmatpush1.bf16.msra.mxu1 %v1948_v63 }
 0x7da   :  { %1288 = vmatprep.subr.bf16.mxu1 %v1956_v2 }
 0x7dd   :  { %1289 = vmatpush1.bf16.msra.mxu1 %v1954_v3 }
 0x7de   :  { %1290 = vmatprep.subr.bf16.mxu1 %v1962_v5 }
 0x7e1   :  { %1291 = vmatpush1.bf16.msra.mxu1 %v1960_v7  ;;  %v1969_v7 = vld [vmem:[%s2604_s10] sm:$0xff]  }
 0x7e2   :  { %1292 = vmatprep.subr.bf16.mxu1 %v1968_v10  ;;  %v1973_v10 = vld [vmem:[%s2604_s10 + $0x20] sm:$0xff]  }
 0x7e5   :  { %1293 = vmatpush1.bf16.msra.mxu1 %v1966_v12 }
 0x7e6   :  { %1782 = vmatprep.subr.bf16.mxu1 %v2001_v0 }
 0x89b   :  { %v1007_v15 = vpop.f32.mrb[20].mxu1 }
 0x89c   :  { %v1008_v17 = vadd.f32 %v1007_v15, %v846_v14  ;;  %v1780_v18 = vpop.f32.mrb[21].mxu1 }
 0x89d   :  { %v1010_v21 = vpop.f32.mrb[22].mxu1 }
 0x89e   :  { %v1016_v22 = vmul.f32 0.5, %v1008_v17  ;;  %v1011_v23 = vadd.f32 %v1010_v21, %v850_v16  ;;  %v1781_v24 = vpop.f32.mrb[23].mxu1  ;;  %vm1014_vm10 = vcmp.gt.f32.partialorder %v1008_v17, 0.0 }
 0x89f   :  { %v1976_v24 = vld [vmem:[%s2604_s10 + $0x38] sm:$0xff]  }
 0x8a0   :  { %vm1015_vm11 = vcmp.gt.f32.partialorder %v1011_v23, 0.0  ;;  %v1017_v25 = vmul.f32 0.5, %v1011_v23  ;;  %v1018_v26 = vsel %vm1014_vm10, %v1008_v17, %v1016_v22 }
 0x8a2   :  { %v1019_v27 = vsel %vm1015_vm11, %v1011_v23, %v1017_v25  ;;  %v1975_v23 = vld [vmem:[%s2604_s10 + $0x30] sm:$0xff]   ;;  %v1062_v25 = vrot.slane %v2519_v57, %v2369_v29  ;;  %v1688_v29 = vld [vmem:[%s2606_s11] ss:$0 sm:$0xff] }
 0x8a3   :  { %v1020_v28 = vpack.c.bf16 %v1019_v27, %v1018_v26 }
 0x8a5   :  { %1268 = vmatmul.mubr.bf16.vlgmr.msra.gmra.mrb[12].mxu0 %v1020_v28  ;;  %1311 = vmatmul.mubr.bf16.vlgmr.msra.gmra.mrb[24].mxu1 %v1020_v28 }
 0x8a6   :  { %1784 = vmatprep.mubr.msk.bf16.mxu1 %vm2002_vm0, %v2001_v0  ;;  %1810 = vmatprep.mubr.msk.bf16.mxu0 %vm2002_vm0, %v2001_v0 }
 0x8a7   :  { %1795 = vmatpush3.bf16.msra.mxu0 %v1969_v7 }
 0x8a8   :  { %1796 = vmatprep.subr.bf16.mxu0 %v2001_v0 }
 0x8ab   :  { %1797 = vmatpush3.bf16.msra.mxu0 %v1970_v19 }
 0x8ac   :  { %1798 = vmatprep.subr.bf16.mxu0 %v2001_v0 }
 0x8af   :  { %1799 = vmatpush3.bf16.msra.mxu0 %v1971_v8 }
 0x8b0   :  { %1800 = vmatprep.subr.bf16.mxu0 %v2001_v0 }
 0x8b3   :  { %1801 = vmatpush3.bf16.msra.mxu0 %v1972_v20 }
 0x8b4   :  { %1802 = vmatprep.subr.bf16.mxu0 %v2001_v0 }
 0x8b7   :  { %1803 = vmatpush3.bf16.msra.mxu0 %v1973_v10 }
 0x8b8   :  { %1804 = vmatprep.subr.bf16.mxu0 %v2001_v0 }
 0x8bb   :  { %1805 = vmatpush3.bf16.msra.mxu0 %v1974_v11 }
 0x8bc   :  { %1806 = vmatprep.subr.bf16.mxu0 %v2001_v0 }
 0x8bf   :  { %1807 = vmatpush3.bf16.msra.mxu0 %v1975_v23 }
 0x8c0   :  { %1808 = vmatprep.subr.bf16.mxu0 %v2001_v0 }
 0x8c3   :  { %1809 = vmatpush3.bf16.msra.mxu0 %v1976_v24 }
 0x978   :  { %v1269_v30 = vpop.f32.mrb[12].mxu0  ;;  %v1312_v31 = vpop.f32.mrb[24].mxu1 }
 0x979   :  { %v2527_v33 = vpop.f32.mrb[13].mxu0  ;;  %v1314_v34 = vpop.f32.mrb[25].mxu1  ;;  %v1270_v37 = vadd.f32 %v1269_v30, %v1058_v47  ;;  %v1313_v38 = vadd.f32 %v1312_v31, %v1066_v60 }
 0x97a   :  { %v1273_v35 = vpop.f32.mrb[14].mxu0  ;;  %v1316_v36 = vpop.f32.mrb[26].mxu1  ;;  %v1315_v54 = vadd.f32 %v1314_v34, %v1070_v32  ;;  %v1272_v26 = vadd.f32 %v2527_v33, %v1062_v25 }
 0x97b   :  { %v1274_v39 = vadd.f32 %v1273_v35, %v1058_v47  ;;  %v1317_v40 = vadd.f32 %v1316_v36, %v1066_v60  ;;  %v2529_v41 = vpop.f32.mrb[15].mxu0  ;;  %v1318_v55 = vpop.f32.mrb[27].mxu1 }
 0x97c   :  { %v1319_v42 = vadd.f32 %v1318_v55, %v1070_v32  ;;  %v1276_v28 = vadd.f32 %v2529_v41, %v1062_v25 }
 0x97d   :  { %v1321_v56 = vpack.c.bf16 %v1274_v39, %v1270_v37  ;;  %v1322_v1 = vpack.c.bf16 %v1317_v40, %v1313_v38 }
 0x97e   :  { %v1395_v9 = vpack.c.bf16 %v1319_v42, %v1315_v54 }
 0x97f   :  { %1783 = vmatpush3.bf16.xpose.msra.mxu1 %v1322_v1 }
 0x980   :  { %1788 = vmatprep.subr.bf16.mxu1 %v2001_v0 }
 0x986   :  { %1785 = vmatmul.mubr.bf16.vlgmr.msra.gmra.mrb[28].mxu1 %v1321_v56 }
 0x987   :  { %1789 = vmatpush3.bf16.msra.mxu1 %v1395_v9  ;;  %1790 = vmatprep.mubr.msk.bf16.mxu1 %vm2002_vm0, %v2001_v0 }
 0xa59   :  { %v1357_v58 = vpop.f32.mrb[28].mxu1 }
 0xa5a   :  { %v1364_v43 = vsel %vm466_vm1, %v1357_v58, -1e+30  ;;  %v1786_v45 = vpop.f32.mrb[29].mxu1 }
 0xa5b   :  { %v1360_v46 = vpop.f32.mrb[30].mxu1  ;;  %v1366_v48 = vsel %vm513_vm2, %v1364_v43, -inf }
 0xa5c   :  { %v1365_v49 = vsel %vm467_vm3, %v1360_v46, -1e+30  ;;  %1367 = vmax.xlane.f32.xlu0 %v1366_v48  ;;  %v1787_v50 = vpop.f32.mrb[31].mxu1 }
 0xa5d   :  { %v1369_v51 = vsel %vm513_vm2, %v1365_v49, -inf }
 0xa5e   :  { %1370 = vmax.xlane.f32.xlu1 %v1369_v51 }
 0xae9   :  { %v1368_v52 = vpop.xlane.xlu0 %1367 }
 0xaea   :  { %v1372_v53 = vsub.f32 %v1364_v43, %v1368_v52 }
 0xaeb   :  { %v1371_v59 = vpop.xlane.xlu1 %1370 }
 0xaec   :  { %v1374_v61 = vmul.f32 1.442695, %v1372_v53  ;;  %v1373_v44 = vsub.f32 %v1365_v49, %v1371_v59 }
 0xaee   :  { %1993 = vpow2.f32 %v1374_v61  ;;  %v1376_v62 = vmul.f32 1.442695, %v1373_v44 }
 0xaf0   :  { %1995 = vpow2.f32 %v1376_v62 }
 0xaf8   :  { %v1994_v63 = vpop.eup %1993 }
 0xaf9   :  { %v1378_v2 = vsel %vm466_vm1, %v1994_v63, 0.0 }
 0xafa   :  { %v1996_v3 = vpop.eup %1995  ;;  %v1380_v4 = vsel %vm513_vm2, %v1378_v2, 0.0 }
 0xafb   :  { %1381 = vadd.xlane.f32.xlu0 %v1380_v4  ;;  %v1379_v5 = vsel %vm467_vm3, %v1996_v3, 0.0 }
 0xafc   :  { %v1383_v6 = vsel %vm513_vm2, %v1379_v5, 0.0 }
 0xafd   :  { %1384 = vadd.xlane.f32.xlu1 %v1383_v6 }
 0xb88   :  { %v1382_v12 = vpop.xlane.xlu0 %1381 }
 0xb89   :  { %vm1386_vm12 = vcmp.gt.f32.partialorder %v1382_v12, 0.0 }
 0xb8a   :  { %v1388_v13 = vsel %vm1386_vm12, %v1382_v12, 1.0  ;;  %v1385_v14 = vpop.xlane.xlu1 %1384 }
 0xb8b   :  { %1997 = vrcp.f32 %v1388_v13  ;;  %vm1387_vm13 = vcmp.gt.f32.partialorder %v1385_v14, 0.0 }
 0xb8c   :  { %v1389_v15 = vsel %vm1387_vm13, %v1385_v14, 1.0 }
 0xb8d   :  { %1999 = vrcp.f32 %v1389_v15 }
 0xb95   :  { %v1998_v16 = vpop.eup %1997 }
 0xb96   :  { %v1392_v18 = vmul.f32 %v1998_v16, %v1378_v2 }
 0xb97   :  { %v2000_v17 = vpop.eup %1999 }
 0xb98   :  { %v1393_v21 = vmul.f32 %v2000_v17, %v1379_v5 }
 0xb9a   :  { %v1394_v22 = vpack.c.bf16 %v1393_v21, %v1392_v18 }
 0xb9c   :  { %1791 = vmatmul.mubr.msk.bf16.vlgmr.msra.gmra.mrb[32].mxu1 %vm513_vm2, %v1394_v22 }
 0xc6f   :  { %v1433_v27 = vpop.f32.mrb[32].mxu1 }
 0xc70   :  { %v1434_v47 = vadd.f32 %v1433_v27, %v1272_v26  ;;  %v1792_v60 = vpop.f32.mrb[33].mxu1 }
 0xc71   :  { %v1436_v30 = vpop.f32.mrb[34].mxu1 }
 0xc72   :  { %v1442_v31 = vmul.f32 0.5, %v1434_v47  ;;  %v1437_v32 = vadd.f32 %v1436_v30, %v1276_v28  ;;  %v1793_v34 = vpop.f32.mrb[35].mxu1  ;;  %vm1440_vm14 = vcmp.gt.f32.partialorder %v1434_v47, 0.0 }
 0xc74   :  { %vm1441_vm15 = vcmp.gt.f32.partialorder %v1437_v32, 0.0  ;;  %v1443_v0 = vmul.f32 0.5, %v1437_v32  ;;  %v1444_v35 = vsel %vm1440_vm14, %v1434_v47, %v1442_v31 }
 0xc76   :  { %v1445_v36 = vsel %vm1441_vm15, %v1437_v32, %v1443_v0 }
 0xc77   :  { %v1446_v37 = vpack.c.bf16 %v1445_v36, %v1444_v35 }
 0xc79   :  { %1703 = vst [vmem:[%s2605_s12] sm:$0xff] %v1446_v37   ;;  %1811 = vmatmul.mubr.bf16.vlgmr.msra.gmra.mrb[16].mxu0 %v1446_v37 }
 0xd4c   :  { %v1561_v57 = vpop.f32.mrb[16].mxu0 }
 0xd4d   :  { %v1562_v33 = vadd.f32 %v1688_v29, %v1561_v57  ;;  %v1812_v38 = vpop.f32.mrb[17].mxu0 }
 0xd4e   :  { %v1564_v39 = vpop.f32.mrb[18].mxu0 }
 0xd4f   :  { %1568 = vst [vmem:[%s2607_s13] sm:$0xff] %v1562_v33  ;;  %v1565_v40 = vadd.f32 %v1688_v29, %v1564_v39  ;;  %v1813_v41 = vpop.f32.mrb[19].mxu0 }
 0xd51   :  { %1569 = vst [vmem:[%s2607_s13 + $0x8] sm:$0xff] %v1565_v40 }

</bundles_post_ra>
